<compile_context>
chip_gen: v5e
topology: v5e:2x2
jax: 0.10.0
libtpu: 0.0.40
codegen_flags: <defaults>
</compile_context>

<pallas_src>
import jax
import jax.numpy as jnp
from jax.experimental import pallas as pl
from jax.experimental.pallas import tpu as pltpu

BN_EPS = 1e-5


def _fused_kernel(x_ref, g_ref, w_ref, gb_ref, o_ref):
    # x_ref:  (Cin,  HW)   bf16 activations (NCHW-flattened)
    # g_ref:  (1,    Cin)  f32 SE gate logits (x239)
    # w_ref:  (Cout, Cin)  bf16 1x1 conv weight
    # gb_ref: (8,    128)  f32, row0 = gamma, row1 = beta (zero-padded)
    # o_ref:  (Cout, HW)   f32 output
    cout = o_ref.shape[0]

    # Sigmoid gate in f32 (EUP), folded into the weight, then cast to bf16
    # so the MXU runs its native bf16 path with f32 accumulation.
    gate = jax.nn.sigmoid(g_ref[...])                                   # (1, Cin)
    w_gated = (w_ref[...].astype(jnp.float32) * gate).astype(jnp.bfloat16)

    y = jnp.dot(w_gated, x_ref[...],
                preferred_element_type=jnp.float32)                     # (Cout, HW) f32

    # BatchNorm2d (training mode): biased batch stats over (N, H, W) per Cout
    # channel == per-row lane reduction.  Single-pass variance, clamped >= 0.
    hw = y.shape[1]
    inv_hw = jnp.float32(1.0 / hw)
    s1 = jnp.sum(y, axis=1, keepdims=True)                              # (Cout, 1)
    s2 = jnp.sum(y * y, axis=1, keepdims=True)                          # (Cout, 1)
    mean = s1 * inv_hw
    var = jnp.maximum(s2 * inv_hw - mean * mean, 0.0)
    inv = jax.lax.rsqrt(var + BN_EPS)

    # One aligned (8,128)->(128,8) transpose turns the packed gamma/beta rows
    # into the (Cout, 1) columns needed for per-row broadcasting.
    gb_t = jnp.transpose(gb_ref[...])                                   # (128, 8)
    gamma = gb_t[0:cout, 0:1]                                           # (Cout, 1)
    beta = gb_t[0:cout, 1:2]                                            # (Cout, 1)

    scale = gamma * inv
    shift = beta - mean * scale
    o_ref[...] = (y * scale + shift).astype(o_ref.dtype)


def sigmoid_mul_conv1x1_bn(x235, x239, conv_w, bn_gamma, bn_beta):
    """x235: (N, Cin, H, W), x239: (N, Cin, 1, 1), conv_w: (Cout, Cin, 1, 1).

    NCHW-native: only free contiguous reshapes in the wrapper, no transposes.
    Requires N == 1 (matches the module) and Cout <= 128 (BN-param packing).
    The bf16 casts of the activation / weight emulate an upstream graph that
    already produces bf16; BN math stays f32.
    """
    N, Cin, H, W = x235.shape
    Cout = conv_w.shape[0]
    assert N == 1, "kernel assumes batch size 1 (as in the reference module)"
    assert Cout <= 128, "BN-parameter packing assumes Cout <= 128"
    HW = H * W

    x_mat = x235.reshape(Cin, HW).astype(jnp.bfloat16)   # free reshape + bf16
    g_row = x239.reshape(1, Cin).astype(jnp.float32)
    w_mat = conv_w.reshape(Cout, Cin).astype(jnp.bfloat16)

    # Coalesced, lane-contiguous, tile-aligned BN parameter block.
    gb = jnp.zeros((8, 128), jnp.float32)
    gb = gb.at[0, :Cout].set(bn_gamma.astype(jnp.float32))
    gb = gb.at[1, :Cout].set(bn_beta.astype(jnp.float32))

    out = pl.pallas_call(
        _fused_kernel,
        out_shape=jax.ShapeDtypeStruct((Cout, HW), jnp.float32),
        in_specs=[
            pl.BlockSpec(memory_space=pltpu.MemorySpace.VMEM),
            pl.BlockSpec(memory_space=pltpu.MemorySpace.VMEM),
            pl.BlockSpec(memory_space=pltpu.MemorySpace.VMEM),
            pl.BlockSpec(memory_space=pltpu.MemorySpace.VMEM),
        ],
        out_specs=pl.BlockSpec(memory_space=pltpu.MemorySpace.VMEM),
    )(x_mat, g_row, w_mat, gb)

    # Free reshape back to NCHW.
    return out.reshape(N, Cout, H, W)


def _reference(x235, x239, conv_w, bn_gamma, bn_beta):
    """Pure-JAX f32 reference mirroring the PyTorch forward (train-mode BN)."""
    gated = jax.nn.sigmoid(x239) * x235                                    # NCHW
    N, Cin, H, W = gated.shape
    Cout = conv_w.shape[0]
    rows = jnp.transpose(gated, (0, 2, 3, 1)).reshape(-1, Cin)
    y = rows @ conv_w.reshape(Cout, Cin).T                                 # (M, Cout)
    mean = jnp.mean(y, axis=0, keepdims=True)
    var = jnp.mean((y - mean) ** 2, axis=0, keepdims=True)
    y = (y - mean) / jnp.sqrt(var + BN_EPS) * bn_gamma.reshape(1, -1) \
        + bn_beta.reshape(1, -1)
    return jnp.transpose(y.reshape(N, H, W, Cout), (0, 3, 1, 2))


if __name__ == "__main__":
    key = jax.random.PRNGKey(0)
    k1, k2, k3, k4, k5 = jax.random.split(key, 5)

    N, Cin, H, W, Cout = 1, 672, 14, 14, 112

    x235 = jax.random.normal(k1, (N, Cin, H, W), dtype=jnp.float32)
    x239 = jax.random.normal(k2, (N, Cin, 1, 1), dtype=jnp.float32)
    conv_w = jax.random.normal(k3, (Cout, Cin, 1, 1), dtype=jnp.float32) * 0.05
    bn_gamma = 1.0 + 0.1 * jax.random.normal(k4, (Cout,), dtype=jnp.float32)
    bn_beta = 0.1 * jax.random.normal(k5, (Cout,), dtype=jnp.float32)

    out = sigmoid_mul_conv1x1_bn(x235, x239, conv_w, bn_gamma, bn_beta)
    out = jax.block_until_ready(out)

    ref = _reference(x235, x239, conv_w, bn_gamma, bn_beta)
    assert out.shape == (N, Cout, H, W), out.shape
    # Tolerance reflects bf16 matmul operands (BN math and accumulation in f32).
    max_err = float(jnp.max(jnp.abs(out - ref)))
    assert jnp.allclose(out, ref, atol=5e-2, rtol=5e-2), max_err

    print("KERNEL_OK")
</pallas_src>

<mosaic_0001>
module attributes {stable_mosaic.version = 11 : i64} {
  func.func @_fused_kernel(%arg0: memref<672x196xbf16, #tpu.memory_space<vmem>>, %arg1: memref<1x672xf32, #tpu.memory_space<vmem>>, %arg2: memref<112x672xbf16, #tpu.memory_space<vmem>>, %arg3: memref<8x128xf32, #tpu.memory_space<vmem>>, %arg4: memref<112x196xf32, #tpu.memory_space<vmem>>) attributes {dimension_semantics = [], scalar_prefetch = 0 : i64, scratch_operands = 0 : i64, tpu.core_type = #tpu.core_type<tc>} {
    %c0 = arith.constant 0 : index
    %c0_0 = arith.constant 0 : index
    %0 = vector.load %arg1[%c0, %c0_0] : memref<1x672xf32, #tpu.memory_space<vmem>>, vector<1x672xf32>
    %1 = arith.negf %0 : vector<1x672xf32>
    %2 = math.exp %1 : vector<1x672xf32>
    %cst = arith.constant 1.000000e+00 : f32
    %3 = vector.broadcast %cst : f32 to vector<1x672xf32>
    %4 = arith.addf %3, %2 : vector<1x672xf32>
    %5 = arith.divf %3, %4 : vector<1x672xf32>
    %c0_1 = arith.constant 0 : index
    %c0_2 = arith.constant 0 : index
    %6 = vector.load %arg2[%c0_1, %c0_2] : memref<112x672xbf16, #tpu.memory_space<vmem>>, vector<112x672xbf16>
    %7 = arith.extf %6 : vector<112x672xbf16> to vector<112x672xf32>
    %8 = vector.broadcast %5 : vector<1x672xf32> to vector<112x672xf32>
    %9 = arith.mulf %7, %8 : vector<112x672xf32>
    %10 = arith.truncf %9 : vector<112x672xf32> to vector<112x672xbf16>
    %c0_3 = arith.constant 0 : index
    %c0_4 = arith.constant 0 : index
    %11 = vector.load %arg0[%c0_3, %c0_4] : memref<672x196xbf16, #tpu.memory_space<vmem>>, vector<672x196xbf16>
    %cst_5 = arith.constant dense<0.000000e+00> : vector<112x196xf32>
    %12 = tpu.matmul %10, %11, %cst_5 {dimension_numbers = #tpu.dot_dimension_numbers<[1], [0], [0], [1], [0, 0, 1, 1], [], []>} : vector<112x672xbf16>, vector<672x196xbf16>, vector<112x196xf32> -> vector<112x196xf32>
    %cst_6 = arith.constant dense<0.000000e+00> : vector<112xf32>
    %13 = vector.multi_reduction <add>, %12, %cst_6 [1] : vector<112x196xf32> to vector<112xf32>
    %14 = vector.shape_cast %13 : vector<112xf32> to vector<112x1xf32>
    %15 = arith.mulf %12, %12 : vector<112x196xf32>
    %cst_7 = arith.constant dense<0.000000e+00> : vector<112xf32>
    %16 = vector.multi_reduction <add>, %15, %cst_7 [1] : vector<112x196xf32> to vector<112xf32>
    %17 = vector.shape_cast %16 : vector<112xf32> to vector<112x1xf32>
    %cst_8 = arith.constant 0.00510204071 : f32
    %18 = vector.broadcast %cst_8 : f32 to vector<112x1xf32>
    %19 = arith.mulf %14, %18 : vector<112x1xf32>
    %cst_9 = arith.constant 0.00510204071 : f32
    %20 = vector.broadcast %cst_9 : f32 to vector<112x1xf32>
    %21 = arith.mulf %17, %20 : vector<112x1xf32>
    %22 = arith.mulf %19, %19 : vector<112x1xf32>
    %23 = arith.subf %21, %22 : vector<112x1xf32>
    %cst_10 = arith.constant 0.000000e+00 : f32
    %24 = vector.broadcast %cst_10 : f32 to vector<112x1xf32>
    %25 = arith.maximumf %23, %24 : vector<112x1xf32>
    %cst_11 = arith.constant 9.99999974E-6 : f32
    %26 = vector.broadcast %cst_11 : f32 to vector<112x1xf32>
    %27 = arith.addf %25, %26 : vector<112x1xf32>
    %28 = math.rsqrt %27 : vector<112x1xf32>
    %c0_12 = arith.constant 0 : index
    %c0_13 = arith.constant 0 : index
    %29 = vector.load %arg3[%c0_12, %c0_13] : memref<8x128xf32, #tpu.memory_space<vmem>>, vector<8x128xf32>
    %30 = tpu.transpose %29, [1, 0] : vector<8x128xf32> -> vector<128x8xf32>
    %31 = vector.extract_strided_slice %30 {offsets = [0, 0], sizes = [112, 1], strides = [1, 1]} : vector<128x8xf32> to vector<112x1xf32>
    %32 = vector.extract_strided_slice %30 {offsets = [0, 1], sizes = [112, 1], strides = [1, 1]} : vector<128x8xf32> to vector<112x1xf32>
    %33 = arith.mulf %31, %28 : vector<112x1xf32>
    %34 = arith.mulf %19, %33 : vector<112x1xf32>
    %35 = arith.subf %32, %34 : vector<112x1xf32>
    %36 = vector.broadcast %33 : vector<112x1xf32> to vector<112x196xf32>
    %37 = arith.mulf %12, %36 : vector<112x196xf32>
    %38 = vector.broadcast %35 : vector<112x1xf32> to vector<112x196xf32>
    %39 = arith.addf %37, %38 : vector<112x196xf32>
    %c0_14 = arith.constant 0 : index
    %c0_15 = arith.constant 0 : index
    %40 = vector.load %arg4[%c0_14, %c0_15] : memref<112x196xf32, #tpu.memory_space<vmem>>, vector<112x196xf32>
    tpu.vector_store %arg4[%c0_14, %c0_15], %39 {strides = array<i32>} : memref<112x196xf32, #tpu.memory_space<vmem>>, vector<112x196xf32>,
    return
  }
}

</mosaic_0001>

<bundles_post_ra>
// kernel: tpu_custom_call.1
= control target key start
LH: loop header
LB: loop body
LE: loop exit
PB: predicated region body
PF: predicated region fallthrough
CT: control target
= control target key end

     0   :  { %vm807_vm4 = vcmask 261120   ;;  %vm1357_vm5 = vcmask 556032   ;;  %s4189_s0 = inlined_call_operand.vmem [shape: bf16[672,196], index: 0, kind: input, shape index: {}]   ;;  %s4190_s1 = inlined_call_operand.vmem [shape: f32[1,672], index: 1, kind: input, shape index: {}]   ;;  %s4191_s2 = inlined_call_operand.vmem [shape: bf16[112,672], index: 2, kind: input, shape index: {}]   ;;  %s4192_s3 = inlined_call_operand.vmem [shape: f32[8,128], index: 3, kind: input, shape index: {}]   ;;  %s4193_s4 = inlined_call_operand.vmem [shape: f32[112,196], index: 4, kind: output, shape index: {}]  }
   0x1   :  { %v2140_v0 = vld [vmem:[%s4189_s0 + $0x70] sm:$0xf]  ;;  %v2447_v1 = vld [vmem:[%s4189_s0 + $0x74] sm:$0xf0]  ;;  %v2132_v11 = vld [vmem:[%s4189_s0 + $0x60] sm:$0xf] }
   0x2   :  { %v2204_v2 = vld [vmem:[%s4189_s0 + $0xf0] sm:$0xf]  ;;  %v2141_v3 = vor.u32 %v2447_v1, %v2140_v0  ;;  %v2463_v4 = vld [vmem:[%s4189_s0 + $0xf4] sm:$0xf0]  ;;  %v2445_v13 = vld [vmem:[%s4189_s0 + $0x64] sm:$0xf0] }
   0x3   :  { %v2268_v5 = vld [vmem:[%s4189_s0 + $0x170] sm:$0xf]  ;;  %v2479_v6 = vld [vmem:[%s4189_s0 + $0x174] sm:$0xf0]  ;;  %v2205_v7 = vor.u32 %v2463_v4, %v2204_v2  ;;  %v2196_v14 = vld [vmem:[%s4189_s0 + $0xe0] sm:$0xf]  ;;  %v2133_v16 = vor.u32 %v2445_v13, %v2132_v11 }
   0x4   :  { %v2269_v8 = vor.u32 %v2479_v6, %v2268_v5  ;;  %v2332_v9 = vld [vmem:[%s4189_s0 + $0x1f0] sm:$0xf]  ;;  %v2495_v10 = vld [vmem:[%s4189_s0 + $0x1f4] sm:$0xf0]  ;;  %829 = vmatpush.bf16.msra.mxu0 %v2141_v3  ;;  %v2461_v15 = vld [vmem:[%s4189_s0 + $0xe4] sm:$0xf0] }
   0x5   :  { %v2333_v12 = vor.u32 %v2495_v10, %v2332_v9  ;;  %873 = vmatpush.bf16.msra.mxu1 %v2205_v7  ;;  %v2197_v17 = vor.u32 %v2461_v15, %v2196_v14  ;;  %v2260_v18 = vld [vmem:[%s4189_s0 + $0x160] sm:$0xf]  ;;  %v2477_v19 = vld [vmem:[%s4189_s0 + $0x164] sm:$0xf0]  ;;  %v2124_v23 = vld [vmem:[%s4189_s0 + $0x50] sm:$0xf] }
   0x6   :  { %917 = vmatpush.bf16.msra.mxu2 %v2269_v8  ;;  %v2324_v20 = vld [vmem:[%s4189_s0 + $0x1e0] sm:$0xf]  ;;  %v2261_v21 = vor.u32 %v2477_v19, %v2260_v18  ;;  %v2493_v22 = vld [vmem:[%s4189_s0 + $0x1e4] sm:$0xf0]  ;;  %v2443_v24 = vld [vmem:[%s4189_s0 + $0x54] sm:$0xf0] }
   0x7   :  { %961 = vmatpush.bf16.msra.mxu3 %v2333_v12  ;;  %v2325_v25 = vor.u32 %v2493_v22, %v2324_v20  ;;  %v2188_v26 = vld [vmem:[%s4189_s0 + $0xd0] sm:$0xf]  ;;  %v2459_v27 = vld [vmem:[%s4189_s0 + $0xd4] sm:$0xf0]  ;;  %v2125_v29 = vor.u32 %v2443_v24, %v2124_v23  ;;  %v2116_v35 = vld [vmem:[%s4189_s0 + $0x40] sm:$0xf] }
   0x8   :  { %v2252_v28 = vld [vmem:[%s4189_s0 + $0x150] sm:$0xf]  ;;  %830 = vmatpush.bf16.msra.mxu0 %v2133_v16  ;;  %v2475_v30 = vld [vmem:[%s4189_s0 + $0x154] sm:$0xf0]  ;;  %v2189_v33 = vor.u32 %v2459_v27, %v2188_v26  ;;  %v2441_v36 = vld [vmem:[%s4189_s0 + $0x44] sm:$0xf0] }
   0x9   :  { %v2316_v31 = vld [vmem:[%s4189_s0 + $0x1d0] sm:$0xf]  ;;  %v2491_v32 = vld [vmem:[%s4189_s0 + $0x1d4] sm:$0xf0]  ;;  %874 = vmatpush.bf16.msra.mxu1 %v2197_v17  ;;  %v2253_v34 = vor.u32 %v2475_v30, %v2252_v28  ;;  %v2180_v37 = vld [vmem:[%s4189_s0 + $0xc0] sm:$0xf]  ;;  %v2117_v44 = vor.u32 %v2441_v36, %v2116_v35 }
   0xa   :  { %918 = vmatpush.bf16.msra.mxu2 %v2261_v21  ;;  %v2317_v38 = vor.u32 %v2491_v32, %v2316_v31  ;;  %v2457_v39 = vld [vmem:[%s4189_s0 + $0xc4] sm:$0xf0]  ;;  %v2244_v40 = vld [vmem:[%s4189_s0 + $0x140] sm:$0xf]  ;;  %v2108_v47 = vld [vmem:[%s4189_s0 + $0x30] sm:$0xf] }
   0xb   :  { %962 = vmatpush.bf16.msra.mxu3 %v2325_v25  ;;  %v2473_v41 = vld [vmem:[%s4189_s0 + $0x144] sm:$0xf0]  ;;  %v2308_v42 = vld [vmem:[%s4189_s0 + $0x1c0] sm:$0xf]  ;;  %v2181_v45 = vor.u32 %v2457_v39, %v2180_v37  ;;  %v2439_v48 = vld [vmem:[%s4189_s0 + $0x34] sm:$0xf0] }
   0xc   :  { %v2489_v43 = vld [vmem:[%s4189_s0 + $0x1c4] sm:$0xf0]  ;;  %831 = vmatpush.bf16.msra.mxu0 %v2125_v29  ;;  %v2245_v46 = vor.u32 %v2473_v41, %v2244_v40  ;;  %v2172_v49 = vld [vmem:[%s4189_s0 + $0xb0] sm:$0xf]  ;;  %v2455_v51 = vld [vmem:[%s4189_s0 + $0xb4] sm:$0xf0]  ;;  %v2109_v56 = vor.u32 %v2439_v48, %v2108_v47 }
   0xd   :  { %875 = vmatpush.bf16.msra.mxu1 %v2189_v33  ;;  %v2309_v50 = vor.u32 %v2489_v43, %v2308_v42  ;;  %v2236_v52 = vld [vmem:[%s4189_s0 + $0x130] sm:$0xf]  ;;  %v2471_v53 = vld [vmem:[%s4189_s0 + $0x134] sm:$0xf0]  ;;  %v2173_v57 = vor.u32 %v2455_v51, %v2172_v49  ;;  %v2100_v59 = vld [vmem:[%s4189_s0 + $0x20] sm:$0xf] }
   0xe   :  { %919 = vmatpush.bf16.msra.mxu2 %v2253_v34  ;;  %v2300_v54 = vld [vmem:[%s4189_s0 + $0x1b0] sm:$0xf]  ;;  %v2487_v55 = vld [vmem:[%s4189_s0 + $0x1b4] sm:$0xf0]  ;;  %v2237_v58 = vor.u32 %v2471_v53, %v2236_v52  ;;  %v2437_v60 = vld [vmem:[%s4189_s0 + $0x24] sm:$0xf0] }
   0xf   :  { %963 = vmatpush.bf16.msra.mxu3 %v2317_v38  ;;  %v2164_v61 = vld [vmem:[%s4189_s0 + $0xa0] sm:$0xf]  ;;  %v2301_v62 = vor.u32 %v2487_v55, %v2300_v54  ;;  %v2453_v63 = vld [vmem:[%s4189_s0 + $0xa4] sm:$0xf0]  ;;  %v2101_v4 = vor.u32 %v2437_v60, %v2100_v59  ;;  %v2092_v5 = vld [vmem:[%s4189_s0 + $0x10] sm:$0xf] }
  0x10   :  { %832 = vmatpush.bf16.msra.mxu0 %v2117_v44  ;;  %v2228_v0 = vld [vmem:[%s4189_s0 + $0x120] sm:$0xf]  ;;  %v2469_v1 = vld [vmem:[%s4189_s0 + $0x124] sm:$0xf0]  ;;  %v2165_v6 = vor.u32 %v2453_v63, %v2164_v61  ;;  %v2435_v8 = vld [vmem:[%s4189_s0 + $0x14] sm:$0xf0] }
  0x11   :  { %876 = vmatpush.bf16.msra.mxu1 %v2181_v45  ;;  %v2292_v2 = vld [vmem:[%s4189_s0 + $0x1a0] sm:$0xf]  ;;  %v2485_v3 = vld [vmem:[%s4189_s0 + $0x1a4] sm:$0xf0]  ;;  %v2229_v7 = vor.u32 %v2469_v1, %v2228_v0  ;;  %v2156_v9 = vld [vmem:[%s4189_s0 + $0x90] sm:$0xf]  ;;  %v2093_v18 = vor.u32 %v2435_v8, %v2092_v5 }
  0x12   :  { %920 = vmatpush.bf16.msra.mxu2 %v2245_v46  ;;  %v2451_v10 = vld [vmem:[%s4189_s0 + $0x94] sm:$0xf0]  ;;  %v2293_v11 = vor.u32 %v2485_v3, %v2292_v2  ;;  %v2220_v12 = vld [vmem:[%s4189_s0 + $0x110] sm:$0xf]  ;;  %v18_v14 = vld [vmem:[%s4190_s1] sm:$0x3f] }
  0x13   :  { %964 = vmatpush.bf16.msra.mxu3 %v2309_v50  ;;  %v2467_v13 = vld [vmem:[%s4189_s0 + $0x114] sm:$0xf0]  ;;  %v2284_v15 = vld [vmem:[%s4189_s0 + $0x190] sm:$0xf]  ;;  %v2081_v17 = vmul.f32 -1.442695, %v18_v14  ;;  %v2157_v21 = vor.u32 %v2451_v10, %v2156_v9 }
  0x14   :  { %833 = vmatpush.bf16.msra.mxu0 %v2109_v56  ;;  %v2483_v16 = vld [vmem:[%s4189_s0 + $0x194] sm:$0xf0]  ;;  %v2084_v19 = vld [vmem:[%s4189_s0] sm:$0xf]  ;;  %v2433_v20 = vld [vmem:[%s4189_s0 + $0x4] sm:$0xf0]  ;;  %v2221_v22 = vor.u32 %v2467_v13, %v2220_v12 }
  0x15   :  { %877 = vmatpush.bf16.msra.mxu1 %v2173_v57  ;;  %v2148_v23 = vld [vmem:[%s4189_s0 + $0x80] sm:$0xf]  ;;  %v2449_v24 = vld [vmem:[%s4189_s0 + $0x84] sm:$0xf0]  ;;  %2524 = vpow2.f32 %v2081_v17  ;;  %v2285_v26 = vor.u32 %v2483_v16, %v2284_v15  ;;  %v2446_v30 = vld [vmem:[%s4189_s0 + $0x74] sm:$0xf]  ;;  %v2085_v33 = vor.u32 %v2433_v20, %v2084_v19 }
  0x16   :  { %921 = vmatpush.bf16.msra.mxu2 %v2237_v58  ;;  %v2212_v25 = vld [vmem:[%s4189_s0 + $0x100] sm:$0xf]  ;;  %v2465_v27 = vld [vmem:[%s4189_s0 + $0x104] sm:$0xf0]  ;;  %v2142_v31 = vld [vmem:[%s4189_s0 + $0x78] sm:$0xf0]  ;;  %v2149_v37 = vor.u32 %v2449_v24, %v2148_v23 }
  0x17   :  { %965 = vmatpush.bf16.msra.mxu3 %v2301_v62  ;;  %v2276_v28 = vld [vmem:[%s4189_s0 + $0x180] sm:$0xf]  ;;  %v2481_v29 = vld [vmem:[%s4189_s0 + $0x184] sm:$0xf0]  ;;  %v2396_v32 = vld [vmem:[%s4189_s0 + $0x270] sm:$0xf]  ;;  %v2213_v38 = vor.u32 %v2465_v27, %v2212_v25  ;;  %v2145_v42 = vor.u32 %v2446_v30, %v2142_v31 }
  0x18   :  { %834 = vmatpush.bf16.msra.mxu0 %v2101_v4  ;;  %v2511_v34 = vld [vmem:[%s4189_s0 + $0x274] sm:$0xf0]  ;;  %v2462_v35 = vld [vmem:[%s4189_s0 + $0xf4] sm:$0xf]  ;;  %v2206_v36 = vld [vmem:[%s4189_s0 + $0xf8] sm:$0xf0]  ;;  %v2277_v41 = vor.u32 %v2481_v29, %v2276_v28 }
  0x19   :  { %878 = vmatpush.bf16.msra.mxu1 %v2165_v6  ;;  %v2412_v39 = vld [vmem:[%s4189_s0 + $0x290] sm:$0xf]  ;;  %v2515_v40 = vld [vmem:[%s4189_s0 + $0x294] sm:$0xf0]  ;;  %v2397_v44 = vor.u32 %v2511_v34, %v2396_v32  ;;  %v2209_v45 = vor.u32 %v2462_v35, %v2206_v36  ;;  %v2444_v46 = vld [vmem:[%s4189_s0 + $0x64] sm:$0xf] }
  0x1a   :  { %922 = vmatpush.bf16.msra.mxu2 %v2229_v7  ;;  %v2134_v47 = vld [vmem:[%s4189_s0 + $0x68] sm:$0xf0]  ;;  %v2413_v49 = vor.u32 %v2515_v40, %v2412_v39  ;;  %v2388_v55 = vld [vmem:[%s4189_s0 + $0x260] sm:$0xf]  ;;  %v2509_v56 = vld [vmem:[%s4189_s0 + $0x264] sm:$0xf0] }
  0x1b   :  { %966 = vmatpush.bf16.msra.mxu3 %v2293_v11  ;;  %v2525_v43 = vpop.eup %2524  ;;  %v2137_v50 = vor.u32 %v2444_v46, %v2134_v47  ;;  %v38_v58 = vld [vmem:[%s4191_s2] sm:$0xff]  ;;  %v2389_v59 = vor.u32 %v2509_v56, %v2388_v55  ;;  %v2198_v61 = vld [vmem:[%s4189_s0 + $0xe8] sm:$0xf0]  ;;  %v2442_v63 = vld [vmem:[%s4189_s0 + $0x54] sm:$0xf] }
  0x1c   :  { %835 = vmatpush.bf16.msra.mxu0 %v2093_v18  ;;  %v22_v48 = vadd.f32 1.0, %v2525_v43  ;;  %v2460_v60 = vld [vmem:[%s4189_s0 + $0xe4] sm:$0xf]  ;;  %v2126_v0 = vld [vmem:[%s4189_s0 + $0x58] sm:$0xf0]  ;;  %v39_v10 = vld [vmem:[%s4191_s2 + $0x8] sm:$0xff]  ;;  %v80_v15 = vunpack.c.l.bf16 %v38_v58  ;;  %v81_v16 = vunpack.c.h.bf16 %v38_v58 }
  0x1d   :  { %879 = vmatpush.bf16.msra.mxu1 %v2157_v21  ;;  %v2201_v62 = vor.u32 %v2460_v60, %v2198_v61  ;;  %v2380_v1 = vld [vmem:[%s4189_s0 + $0x250] sm:$0xf]  ;;  %v2129_v3 = vor.u32 %v2442_v63, %v2126_v0  ;;  %v2507_v4 = vld [vmem:[%s4189_s0 + $0x254] sm:$0xf0]  ;;  %v2458_v5 = vld [vmem:[%s4189_s0 + $0xd4] sm:$0xf]  ;;  %v82_v20 = vunpack.c.l.bf16 %v39_v10  ;;  %v83_v23 = vunpack.c.h.bf16 %v39_v10 }
  0x1e   :  { %923 = vmatpush.bf16.msra.mxu2 %v2221_v22  ;;  %2526 = vrcp.f32 %v22_v48  ;;  %v32_v53 = vand.u32 2147483647, %v22_v48  ;;  %v34_v54 = vand.u32 2147483648, %v22_v48  ;;  %vm28_vm0 = vweird.f32 %v22_v48  ;;  %v2190_v6 = vld [vmem:[%s4189_s0 + $0xd8] sm:$0xf0]  ;;  %v42_v14 = vld [vmem:[%s4191_s2 + $0x20] sm:$0xff] }
  0x1f   :  { %967 = vmatpush.bf16.msra.mxu3 %v2285_v26  ;;  %v41_v9 = vld [vmem:[%s4191_s2 + $0x18] sm:$0xff]  ;;  %v2381_v11 = vor.u32 %v2507_v4, %v2380_v1  ;;  %v2193_v12 = vor.u32 %v2458_v5, %v2190_v6  ;;  %v88_v22 = vunpack.c.l.bf16 %v42_v14  ;;  %v89_v24 = vunpack.c.h.bf16 %v42_v14  ;;  %v2118_v46 = vld [vmem:[%s4189_s0 + $0x48] sm:$0xf0]  ;;  %v2372_v47 = vld [vmem:[%s4189_s0 + $0x240] sm:$0xf] }
  0x20   :  { %836 = vmatpush.bf16.msra.mxu0 %v2085_v33  ;;  %v35_v8 = vor.u32 1.1754944e-38, %v34_v54  ;;  %vm33_vm3 = vcmp.eq.f32.partialorder %v32_v53, 8.507059e+37  ;;  %v86_v18 = vunpack.c.l.bf16 %v41_v9  ;;  %v87_v19 = vunpack.c.h.bf16 %v41_v9  ;;  %v45_v43 = vld [vmem:[%s4191_s2 + $0x38] sm:$0xff]  ;;  %v50_v10 = vld [vmem:[%s4191_s2 + $0x60] sm:$0xff]  ;;  %v2438_v14 = vld [vmem:[%s4189_s0 + $0x34] sm:$0xf] }
  0x21   :  { %880 = vmatpush.bf16.msra.mxu1 %v2149_v37  ;;  %v94_v55 = vunpack.c.l.bf16 %v45_v43  ;;  %v95_v58 = vunpack.c.h.bf16 %v45_v43 }
  0x22   :  { %924 = vmatpush.bf16.msra.mxu2 %v2213_v38 }
  0x23   :  { %968 = vmatpush.bf16.msra.mxu3 %v2277_v41  ;;  %v44_v41 = vld [vmem:[%s4191_s2 + $0x30] sm:$0xff] }
  0x24   :  { %1005 = vmatpush.bf16.msrb.mxu0 %v2397_v44  ;;  %v2527_v51 = vpop.eup %2526  ;;  %v48_v44 = vld [vmem:[%s4191_s2 + $0x50] sm:$0xff]  ;;  %v93_v53 = vunpack.c.h.bf16 %v44_v41 }
  0x25   :  { %1055 = vmatpush.bf16.msrb.mxu1 %v2413_v49  ;;  %v24_v52 = vmul.f32 %v2527_v51, %v22_v48  ;;  %vm29_vm1 = vweird.f32 %v2527_v51  ;;  %v2505_v48 = vld [vmem:[%s4189_s0 + $0x244] sm:$0xf0]  ;;  %v2456_v49 = vld [vmem:[%s4189_s0 + $0xc4] sm:$0xf]  ;;  %v100_v56 = vunpack.c.l.bf16 %v48_v44 }
  0x26   :  { %1093 = vmatpush.bf16.msrb.mxu2 %v2145_v42  ;;  %vm2844_vm2 = vmor %vm28_vm0, %vm29_vm1  ;;  %v47_v42 = vld [vmem:[%s4191_s2 + $0x48] sm:$0xff]  ;;  %v2373_v60 = vor.u32 %v2505_v48, %v2372_v47 }
  0x27   :  { %1137 = vmatpush.bf16.msrb.mxu3 %v2209_v45  ;;  %v25_v57 = vsub.f32 1.0, %v24_v52  ;;  %v2440_v45 = vld [vmem:[%s4189_s0 + $0x44] sm:$0xf]  ;;  %v98_v52 = vunpack.c.l.bf16 %v47_v42  ;;  %v99_v54 = vunpack.c.h.bf16 %v47_v42 }
  0x28   :  { %1006 = vmatpush.bf16.msrb.mxu0 %v2389_v59  ;;  %v101_v59 = vunpack.c.h.bf16 %v48_v44 }
  0x29   :  { %v26_v2 = vmul.f32 %v2527_v51, %v25_v57  ;;  %v2121_v57 = vor.u32 %v2440_v45, %v2118_v46 }
  0x2a   :  { %1094 = vmatpush.bf16.msrb.mxu2 %v2137_v50  ;;  %v2182_v50 = vld [vmem:[%s4189_s0 + $0xc8] sm:$0xf0] }
  0x2b   :  { %1138 = vmatpush.bf16.msrb.mxu3 %v2201_v62  ;;  %v27_v13 = vadd.f32 %v2527_v51, %v26_v2  ;;  %v2185_v61 = vor.u32 %v2456_v49, %v2182_v50 }
  0x2c   :  { %1007 = vmatpush.bf16.msrb.mxu0 %v2381_v11  ;;  %v53_v11 = vld [vmem:[%s4191_s2 + $0x78] sm:$0xff] }
  0x2d   :  { %v31_v17 = vsel %vm2844_vm2, %v2527_v51, %v27_v13  ;;  %v92_v51 = vunpack.c.l.bf16 %v44_v41  ;;  %v54_v13 = vld [vmem:[%s4191_s2 + $0x80] sm:$0xff] }
  0x2e   :  { %1095 = vmatpush.bf16.msrb.mxu2 %v2129_v3  ;;  %v2859_v21 = vsel %vm33_vm3, %v35_v8, %v31_v17  ;;  %v113_v42 = vunpack.c.h.bf16 %v54_v13 }
  0x2f   :  { %1139 = vmatpush.bf16.msrb.mxu3 %v2193_v12  ;;  %v2862_v25 = vperm.slane %v2859_v21, 0  ;;  %v2865_v26 = vperm.slane %v2859_v21, 1  ;;  %v2868_v27 = vperm.slane %v2859_v21, 2  ;;  %v2871_v28 = vperm.slane %v2859_v21, 3  ;;  %v51_v12 = vld [vmem:[%s4191_s2 + $0x68] sm:$0xff] }
  0x30   :  { %1008 = vmatpush.bf16.msrb.mxu0 %v2373_v60  ;;  %v107_v41 = vunpack.c.h.bf16 %v51_v12  ;;  %v2102_v60 = vld [vmem:[%s4189_s0 + $0x28] sm:$0xf0] }
  0x31   :  { %v177_v29 = vmul.f32 %v2862_v25, %v80_v15  ;;  %v183_v30 = vmul.f32 %v2862_v25, %v86_v18  ;;  %v178_v31 = vmul.f32 %v2865_v26, %v81_v16  ;;  %v184_v32 = vmul.f32 %v2865_v26, %v87_v19  ;;  %v2110_v15 = vld [vmem:[%s4189_s0 + $0x38] sm:$0xf0]  ;;  %v2364_v16 = vld [vmem:[%s4189_s0 + $0x230] sm:$0xf]  ;;  %v2503_v18 = vld [vmem:[%s4189_s0 + $0x234] sm:$0xf0] }
  0x32   :  { %v179_v33 = vmul.f32 %v2868_v27, %v82_v20  ;;  %v185_v34 = vmul.f32 %v2868_v27, %v88_v22  ;;  %v180_v35 = vmul.f32 %v2871_v28, %v83_v23  ;;  %v186_v36 = vmul.f32 %v2871_v28, %v89_v24  ;;  %1096 = vmatpush.bf16.msrb.mxu2 %v2121_v57  ;;  %v2454_v19 = vld [vmem:[%s4189_s0 + $0xb4] sm:$0xf]  ;;  %v2174_v20 = vld [vmem:[%s4189_s0 + $0xb8] sm:$0xf0] }
  0x33   :  { %v2881_v37 = vpack.c.bf16 %v183_v30, %v177_v29  ;;  %v2883_v38 = vpack.c.bf16 %v184_v32, %v178_v31  ;;  %1140 = vmatpush.bf16.msrb.mxu3 %v2185_v61  ;;  %v189_v62 = vmul.f32 %v2862_v25, %v92_v51  ;;  %v195_v63 = vmul.f32 %v2862_v25, %v98_v52  ;;  %v2404_v29 = vld [vmem:[%s4189_s0 + $0x280] sm:$0xf]  ;;  %v2513_v30 = vld [vmem:[%s4189_s0 + $0x284] sm:$0xf0]  ;;  %v57_v57 = vld [vmem:[%s4191_s2 + $0x98] sm:$0xff] }
  0x34   :  { %v2885_v39 = vpack.c.bf16 %v185_v34, %v179_v33  ;;  %v2887_v40 = vpack.c.bf16 %v186_v36, %v180_v35  ;;  %v190_v0 = vmul.f32 %v2865_v26, %v93_v53  ;;  %v196_v1 = vmul.f32 %v2865_v26, %v99_v54  ;;  %v2356_v61 = vld [vmem:[%s4189_s0 + $0x220] sm:$0xf] }
  0x35   :  { %837 = vmatmul.bf16.vlgmr.msra.gmra.mxu0 %v2881_v37  ;;  %881 = vmatmul.bf16.vlgmr.msra.gmra.mxu1 %v2883_v38  ;;  %v191_v2 = vmul.f32 %v2868_v27, %v94_v55  ;;  %v197_v3 = vmul.f32 %v2868_v27, %v100_v56  ;;  %v192_v4 = vmul.f32 %v2871_v28, %v95_v58  ;;  %v104_v22 = vunpack.c.l.bf16 %v50_v10  ;;  %v56_v55 = vld [vmem:[%s4191_s2 + $0x90] sm:$0xff]  ;;  %v59_v56 = vld [vmem:[%s4191_s2 + $0xa8] sm:$0xff] }
  0x36   :  { %925 = vmatmul.bf16.vlgmr.msra.gmra.mxu2 %v2885_v39  ;;  %969 = vmatmul.bf16.vlgmr.msra.gmra.mxu3 %v2887_v40  ;;  %v198_v5 = vmul.f32 %v2871_v28, %v101_v59  ;;  %v2931_v6 = vpack.c.bf16 %v195_v63, %v189_v62  ;;  %v2933_v7 = vpack.c.bf16 %v196_v1, %v190_v0  ;;  %v110_v31 = vunpack.c.l.bf16 %v53_v11  ;;  %v60_v58 = vld [vmem:[%s4191_s2 + $0xb0] sm:$0xff]  ;;  %v2436_v59 = vld [vmem:[%s4189_s0 + $0x24] sm:$0xf]  ;;  %v2501_v63 = vld [vmem:[%s4189_s0 + $0x224] sm:$0xf0] }
  0x37   :  { %v2935_v8 = vpack.c.bf16 %v197_v3, %v191_v2  ;;  %v2113_v17 = vor.u32 %v2438_v14, %v2110_v15  ;;  %v2365_v23 = vor.u32 %v2503_v18, %v2364_v16  ;;  %v2177_v24 = vor.u32 %v2454_v19, %v2174_v20  ;;  %v2452_v0 = vld [vmem:[%s4189_s0 + $0xa4] sm:$0xf]  ;;  %v2166_v1 = vld [vmem:[%s4189_s0 + $0xa8] sm:$0xf0] }
  0x38   :  { %v2937_v9 = vpack.c.bf16 %v198_v5, %v192_v4  ;;  %v105_v32 = vunpack.c.h.bf16 %v50_v10  ;;  %v111_v33 = vunpack.c.h.bf16 %v53_v11  ;;  %v2405_v34 = vor.u32 %v2513_v30, %v2404_v29 }
  0x39   :  { %1097 = vmatpush.bf16.msrb.mxu2 %v2113_v17  ;;  %v106_v35 = vunpack.c.l.bf16 %v51_v12  ;;  %v112_v36 = vunpack.c.l.bf16 %v54_v13  ;;  %1009 = vmatpush.bf16.msrb.mxu0 %v2365_v23  ;;  %v201_v43 = vmul.f32 %v2862_v25, %v104_v22  ;;  %v207_v44 = vmul.f32 %v2862_v25, %v110_v31 }
  0x3a   :  { %1141 = vmatpush.bf16.msrb.mxu3 %v2177_v24  ;;  %1056 = vmatpush.bf16.msrb.mxu1 %v2405_v34  ;;  %v202_v45 = vmul.f32 %v2865_v26, %v105_v32  ;;  %v208_v46 = vmul.f32 %v2865_v26, %v111_v33  ;;  %v204_v49 = vmul.f32 %v2871_v28, %v107_v41  ;;  %v116_v4 = vunpack.c.l.bf16 %v56_v55  ;;  %v62_v33 = vld [vmem:[%s4191_s2 + $0xc0] sm:$0xff]  ;;  %v65_v34 = vld [vmem:[%s4191_s2 + $0xd8] sm:$0xff]  ;;  %v2434_v41 = vld [vmem:[%s4189_s0 + $0x14] sm:$0xf] }
  0x3b   :  { %v203_v47 = vmul.f32 %v2868_v27, %v106_v35  ;;  %v209_v48 = vmul.f32 %v2868_v27, %v112_v36  ;;  %v210_v50 = vmul.f32 %v2871_v28, %v113_v42  ;;  %v2987_v51 = vpack.c.bf16 %v207_v44, %v201_v43  ;;  %v63_v35 = vld [vmem:[%s4191_s2 + $0xc8] sm:$0xff]  ;;  %v66_v36 = vld [vmem:[%s4191_s2 + $0xe0] sm:$0xff]  ;;  %v2094_v42 = vld [vmem:[%s4189_s0 + $0x18] sm:$0xf0] }
  0x3c   :  { %v2989_v52 = vpack.c.bf16 %v208_v46, %v202_v45  ;;  %v2105_v62 = vor.u32 %v2436_v59, %v2102_v60  ;;  %v2357_v2 = vor.u32 %v2501_v63, %v2356_v61  ;;  %v2169_v3 = vor.u32 %v2452_v0, %v2166_v1  ;;  %v2348_v43 = vld [vmem:[%s4189_s0 + $0x210] sm:$0xf]  ;;  %v2499_v45 = vld [vmem:[%s4189_s0 + $0x214] sm:$0xf0]  ;;  %v2450_v46 = vld [vmem:[%s4189_s0 + $0x94] sm:$0xf] }
  0x3d   :  { %v2991_v53 = vpack.c.bf16 %v209_v48, %v203_v47  ;;  %v2993_v54 = vpack.c.bf16 %v210_v50, %v204_v49  ;;  %v122_v5 = vunpack.c.l.bf16 %v59_v56  ;;  %v117_v10 = vunpack.c.h.bf16 %v56_v55  ;;  %v2158_v47 = vld [vmem:[%s4189_s0 + $0x98] sm:$0xf0] }
  0x3e   :  { %v123_v11 = vunpack.c.h.bf16 %v59_v56  ;;  %1098 = vmatpush.bf16.msrb.mxu2 %v2105_v62  ;;  %v118_v12 = vunpack.c.l.bf16 %v57_v57  ;;  %v124_v13 = vunpack.c.l.bf16 %v60_v58  ;;  %v119_v14 = vunpack.c.h.bf16 %v57_v57  ;;  %1010 = vmatpush.bf16.msrb.mxu0 %v2357_v2 }
  0x3f   :  { %v125_v15 = vunpack.c.h.bf16 %v60_v58  ;;  %1142 = vmatpush.bf16.msrb.mxu3 %v2169_v3  ;;  %v213_v16 = vmul.f32 %v2862_v25, %v116_v4  ;;  %v219_v17 = vmul.f32 %v2862_v25, %v122_v5  ;;  %v214_v18 = vmul.f32 %v2865_v26, %v117_v10 }
  0x40   :  { %v220_v19 = vmul.f32 %v2865_v26, %v123_v11  ;;  %v215_v20 = vmul.f32 %v2868_v27, %v118_v12  ;;  %v221_v22 = vmul.f32 %v2868_v27, %v124_v13  ;;  %v216_v23 = vmul.f32 %v2871_v28, %v119_v14  ;;  %v68_v14 = vld [vmem:[%s4191_s2 + $0xf0] sm:$0xff] }
  0x41   :  { %v222_v24 = vmul.f32 %v2871_v28, %v125_v15  ;;  %v3037_v29 = vpack.c.bf16 %v219_v17, %v213_v16  ;;  %v2097_v44 = vor.u32 %v2434_v41, %v2094_v42  ;;  %v2349_v48 = vor.u32 %v2499_v45, %v2348_v43  ;;  %v71_v15 = vld [vmem:[%s4191_s2 + $0x108] sm:$0xff]  ;;  %v69_v16 = vld [vmem:[%s4191_s2 + $0xf8] sm:$0xff]  ;;  %v72_v17 = vld [vmem:[%s4191_s2 + $0x110] sm:$0xff] }
  0x42   :  { %v3039_v30 = vpack.c.bf16 %v220_v19, %v214_v18  ;;  %v3041_v31 = vpack.c.bf16 %v221_v22, %v215_v20  ;;  %v2161_v49 = vor.u32 %v2450_v46, %v2158_v47  ;;  %v128_v50 = vunpack.c.l.bf16 %v62_v33  ;;  %v2432_v18 = vld [vmem:[%s4189_s0 + $0x4] sm:$0xf]  ;;  %v2086_v19 = vld [vmem:[%s4189_s0 + $0x8] sm:$0xf0]  ;;  %v2340_v20 = vld [vmem:[%s4189_s0 + $0x200] sm:$0xf] }
  0x43   :  { %v3043_v32 = vpack.c.bf16 %v222_v24, %v216_v23  ;;  %v134_v55 = vunpack.c.l.bf16 %v65_v34  ;;  %v129_v56 = vunpack.c.h.bf16 %v62_v33  ;;  %v135_v57 = vunpack.c.h.bf16 %v65_v34  ;;  %1099 = vmatpush.bf16.msrb.mxu2 %v2097_v44  ;;  %1011 = vmatpush.bf16.msrb.mxu0 %v2349_v48  ;;  %v2497_v23 = vld [vmem:[%s4189_s0 + $0x204] sm:$0xf0]  ;;  %v2448_v24 = vld [vmem:[%s4189_s0 + $0x84] sm:$0xf]  ;;  %v2150_v33 = vld [vmem:[%s4189_s0 + $0x88] sm:$0xf0] }
  0x44   :  { %v130_v58 = vunpack.c.l.bf16 %v63_v35  ;;  %v136_v59 = vunpack.c.l.bf16 %v66_v36  ;;  %v131_v60 = vunpack.c.h.bf16 %v63_v35  ;;  %v137_v61 = vunpack.c.h.bf16 %v66_v36  ;;  %1143 = vmatpush.bf16.msrb.mxu3 %v2161_v49 }
  0x45   :  { %842 = vmatmul.bf16.gmra.mxu0 %v2931_v6  ;;  %886 = vmatmul.bf16.gmra.mxu1 %v2933_v7  ;;  %v225_v62 = vmul.f32 %v2862_v25, %v128_v50  ;;  %v231_v63 = vmul.f32 %v2862_v25, %v134_v55  ;;  %v226_v0 = vmul.f32 %v2865_v26, %v129_v56  ;;  %v140_v36 = vunpack.c.l.bf16 %v68_v14 }
  0x46   :  { %930 = vmatmul.bf16.gmra.mxu2 %v2935_v8  ;;  %974 = vmatmul.bf16.gmra.mxu3 %v2937_v9  ;;  %v232_v1 = vmul.f32 %v2865_v26, %v135_v57  ;;  %v227_v2 = vmul.f32 %v2868_v27, %v130_v58  ;;  %v233_v3 = vmul.f32 %v2868_v27, %v136_v59  ;;  %v146_v41 = vunpack.c.l.bf16 %v71_v15 }
  0x47   :  { %v228_v4 = vmul.f32 %v2871_v28, %v131_v60  ;;  %v234_v5 = vmul.f32 %v2871_v28, %v137_v61  ;;  %v3087_v10 = vpack.c.bf16 %v231_v63, %v225_v62  ;;  %v2089_v22 = vor.u32 %v2432_v18, %v2086_v19  ;;  %v2414_v18 = vld [vmem:[%s4189_s0 + $0x298] sm:$0xf0] }
  0x48   :  { %v3089_v11 = vpack.c.bf16 %v232_v1, %v226_v0  ;;  %v3091_v12 = vpack.c.bf16 %v233_v3, %v227_v2  ;;  %v2341_v34 = vor.u32 %v2497_v23, %v2340_v20  ;;  %v2153_v35 = vor.u32 %v2448_v24, %v2150_v33  ;;  %v74_v0 = vld [vmem:[%s4191_s2 + $0x120] sm:$0xff]  ;;  %v77_v1 = vld [vmem:[%s4191_s2 + $0x138] sm:$0xff]  ;;  %v75_v2 = vld [vmem:[%s4191_s2 + $0x128] sm:$0xff] }
  0x49   :  { %v3093_v13 = vpack.c.bf16 %v234_v5, %v228_v4  ;;  %v141_v42 = vunpack.c.h.bf16 %v68_v14  ;;  %v147_v43 = vunpack.c.h.bf16 %v71_v15  ;;  %1100 = vmatpush.bf16.msrb.mxu2 %v2089_v22  ;;  %v142_v44 = vunpack.c.l.bf16 %v69_v16  ;;  %v78_v3 = vld [vmem:[%s4191_s2 + $0x140] sm:$0xff]  ;;  %v2510_v4 = vld [vmem:[%s4189_s0 + $0x274] sm:$0xf]  ;;  %v2398_v5 = vld [vmem:[%s4189_s0 + $0x278] sm:$0xf0] }
  0x4a   :  { %v148_v45 = vunpack.c.l.bf16 %v72_v17  ;;  %v143_v46 = vunpack.c.h.bf16 %v69_v16  ;;  %v149_v47 = vunpack.c.h.bf16 %v72_v17  ;;  %1012 = vmatpush.bf16.msrb.mxu0 %v2341_v34  ;;  %1144 = vmatpush.bf16.msrb.mxu3 %v2153_v35  ;;  %v237_v48 = vmul.f32 %v2862_v25, %v140_v36  ;;  %v2478_v14 = vld [vmem:[%s4189_s0 + $0x174] sm:$0xf]  ;;  %v2270_v16 = vld [vmem:[%s4189_s0 + $0x178] sm:$0xf0] }
  0x4b   :  { %v243_v49 = vmul.f32 %v2862_v25, %v146_v41  ;;  %v238_v50 = vmul.f32 %v2865_v26, %v141_v42  ;;  %v244_v55 = vmul.f32 %v2865_v26, %v147_v43  ;;  %v239_v56 = vmul.f32 %v2868_v27, %v142_v44  ;;  %v2514_v17 = vld [vmem:[%s4189_s0 + $0x294] sm:$0xf]  ;;  %v2334_v24 = vld [vmem:[%s4189_s0 + $0x1f8] sm:$0xf0] }
  0x4c   :  { %v245_v57 = vmul.f32 %v2868_v27, %v148_v45  ;;  %v240_v58 = vmul.f32 %v2871_v28, %v143_v46  ;;  %v246_v59 = vmul.f32 %v2871_v28, %v149_v47  ;;  %v2401_v15 = vor.u32 %v2510_v4, %v2398_v5  ;;  %v2494_v23 = vld [vmem:[%s4189_s0 + $0x1f4] sm:$0xf]  ;;  %v2492_v4 = vld [vmem:[%s4189_s0 + $0x1e4] sm:$0xf] }
  0x4d   :  { %v3137_v60 = vpack.c.bf16 %v243_v49, %v237_v48  ;;  %v3139_v61 = vpack.c.bf16 %v244_v55, %v238_v50  ;;  %v152_v19 = vunpack.c.l.bf16 %v74_v0  ;;  %v2273_v20 = vor.u32 %v2478_v14, %v2270_v16  ;;  %v2326_v14 = vld [vmem:[%s4189_s0 + $0x1e8] sm:$0xf0] }
  0x4e   :  { %v3141_v62 = vpack.c.bf16 %v245_v57, %v239_v56  ;;  %v3143_v63 = vpack.c.bf16 %v246_v59, %v240_v58  ;;  %v2417_v22 = vor.u32 %v2514_v17, %v2414_v18  ;;  %v158_v33 = vunpack.c.l.bf16 %v77_v1  ;;  %1269 = vmatpush.bf16.msra.mxu2 %v2401_v15 }
  0x4f   :  { %v153_v34 = vunpack.c.h.bf16 %v74_v0  ;;  %v159_v35 = vunpack.c.h.bf16 %v77_v1  ;;  %v2337_v36 = vor.u32 %v2494_v23, %v2334_v24  ;;  %v154_v41 = vunpack.c.l.bf16 %v75_v2  ;;  %1181 = vmatpush.bf16.msra.mxu0 %v2273_v20  ;;  %v43_v1 = vld [vmem:[%s4191_s2 + $0x28] sm:$0xff] }
  0x50   :  { %v160_v42 = vunpack.c.l.bf16 %v78_v3  ;;  %v155_v43 = vunpack.c.h.bf16 %v75_v2  ;;  %v161_v44 = vunpack.c.h.bf16 %v78_v3  ;;  %1319 = vmatpush.bf16.msra.mxu3 %v2417_v22  ;;  %v249_v45 = vmul.f32 %v2862_v25, %v152_v19  ;;  %v2476_v2 = vld [vmem:[%s4189_s0 + $0x164] sm:$0xf]  ;;  %v2262_v3 = vld [vmem:[%s4189_s0 + $0x168] sm:$0xf0] }
  0x51   :  { %1225 = vmatpush.bf16.msra.mxu1 %v2337_v36  ;;  %v255_v46 = vmul.f32 %v2862_v25, %v158_v33  ;;  %v250_v47 = vmul.f32 %v2865_v26, %v153_v34  ;;  %v256_v48 = vmul.f32 %v2865_v26, %v159_v35  ;;  %v251_v49 = vmul.f32 %v2868_v27, %v154_v41  ;;  %v2508_v25 = vld [vmem:[%s4189_s0 + $0x264] sm:$0xf]  ;;  %v2390_v26 = vld [vmem:[%s4189_s0 + $0x268] sm:$0xf0]  ;;  %v2382_v41 = vld [vmem:[%s4189_s0 + $0x258] sm:$0xf0] }
  0x52   :  { %v257_v50 = vmul.f32 %v2868_v27, %v160_v42  ;;  %v252_v55 = vmul.f32 %v2871_v28, %v155_v43  ;;  %v258_v56 = vmul.f32 %v2871_v28, %v161_v44  ;;  %v2393_v27 = vor.u32 %v2508_v25, %v2390_v26  ;;  %v40_v28 = vld [vmem:[%s4191_s2 + $0x10] sm:$0xff]  ;;  %v46_v43 = vld [vmem:[%s4191_s2 + $0x40] sm:$0xff] }
  0x53   :  { %v3193_v57 = vpack.c.bf16 %v255_v46, %v249_v45  ;;  %v3195_v58 = vpack.c.bf16 %v256_v48, %v250_v47  ;;  %v2265_v5 = vor.u32 %v2476_v2, %v2262_v3  ;;  %v84_v15 = vunpack.c.l.bf16 %v40_v28  ;;  %v2474_v42 = vld [vmem:[%s4189_s0 + $0x154] sm:$0xf]  ;;  %v2254_v45 = vld [vmem:[%s4189_s0 + $0x158] sm:$0xf0]  ;;  %v2504_v26 = vld [vmem:[%s4189_s0 + $0x244] sm:$0xf] }
  0x54   :  { %v3197_v59 = vpack.c.bf16 %v257_v50, %v251_v49  ;;  %v3199_v0 = vpack.c.bf16 %v258_v56, %v252_v55  ;;  %1270 = vmatpush.bf16.msra.mxu2 %v2393_v27  ;;  %v3230_v16 = vperm.slane %v2859_v21, 4  ;;  %v2329_v17 = vor.u32 %v2492_v4, %v2326_v14  ;;  %v49_v46 = vld [vmem:[%s4191_s2 + $0x58] sm:$0xff]  ;;  %v2490_v48 = vld [vmem:[%s4189_s0 + $0x1d4] sm:$0xf]  ;;  %v2374_v27 = vld [vmem:[%s4189_s0 + $0x248] sm:$0xf0] }
  0x55   :  { %847 = vmatmul.bf16.gmra.mxu0 %v2987_v51  ;;  %891 = vmatmul.bf16.gmra.mxu1 %v2989_v52  ;;  %v85_v18 = vunpack.c.h.bf16 %v40_v28  ;;  %v90_v19 = vunpack.c.l.bf16 %v43_v1  ;;  %v91_v20 = vunpack.c.h.bf16 %v43_v1  ;;  %v3233_v22 = vperm.slane %v2859_v21, 5  ;;  %v2506_v21 = vld [vmem:[%s4189_s0 + $0x254] sm:$0xf]  ;;  %v2318_v49 = vld [vmem:[%s4189_s0 + $0x1d8] sm:$0xf0] }
  0x56   :  { %935 = vmatmul.bf16.gmra.mxu2 %v2991_v53  ;;  %979 = vmatmul.bf16.gmra.mxu3 %v2993_v54  ;;  %v181_v23 = vmul.f32 %v3230_v16, %v84_v15  ;;  %v2385_v44 = vor.u32 %v2506_v21, %v2382_v41  ;;  %v2257_v47 = vor.u32 %v2474_v42, %v2254_v45  ;;  %v96_v55 = vunpack.c.l.bf16 %v46_v43 }
  0x57   :  { %1182 = vmatpush.bf16.msra.mxu0 %v2265_v5  ;;  %1226 = vmatpush.bf16.msra.mxu1 %v2329_v17  ;;  %v187_v24 = vmul.f32 %v3230_v16, %v90_v19  ;;  %v182_v33 = vmul.f32 %v3233_v22, %v85_v18  ;;  %v188_v34 = vmul.f32 %v3233_v22, %v91_v20  ;;  %v102_v56 = vunpack.c.l.bf16 %v49_v46  ;;  %v2472_v18 = vld [vmem:[%s4189_s0 + $0x144] sm:$0xf]  ;;  %v2246_v19 = vld [vmem:[%s4189_s0 + $0x148] sm:$0xf0] }
  0x58   :  { %1271 = vmatpush.bf16.msra.mxu2 %v2385_v44  ;;  %v2321_v50 = vor.u32 %v2490_v48, %v2318_v49  ;;  %v193_v25 = vmul.f32 %v3230_v16, %v96_v55  ;;  %v2377_v3 = vor.u32 %v2504_v26, %v2374_v27  ;;  %v2488_v20 = vld [vmem:[%s4189_s0 + $0x1c4] sm:$0xf]  ;;  %v2502_v55 = vld [vmem:[%s4189_s0 + $0x234] sm:$0xf] }
  0x59   :  { %v3239_v35 = vpack.c.bf16 %v187_v24, %v181_v23  ;;  %v3241_v36 = vpack.c.bf16 %v188_v34, %v182_v33  ;;  %v199_v28 = vmul.f32 %v3230_v16, %v102_v56  ;;  %v52_v23 = vld [vmem:[%s4191_s2 + $0x70] sm:$0xff]  ;;  %v2249_v24 = vor.u32 %v2472_v18, %v2246_v19  ;;  %v2310_v33 = vld [vmem:[%s4189_s0 + $0x1c8] sm:$0xf0] }
  0x5a   :  { %v55_v34 = vld [vmem:[%s4191_s2 + $0x88] sm:$0xff]  ;;  %v2313_v21 = vor.u32 %v2488_v20, %v2310_v33  ;;  %v108_v41 = vunpack.c.l.bf16 %v52_v23  ;;  %v109_v44 = vunpack.c.h.bf16 %v52_v23  ;;  %v2470_v56 = vld [vmem:[%s4189_s0 + $0x134] sm:$0xf] }
  0x5b   :  { %1183 = vmatpush.bf16.msra.mxu0 %v2257_v47  ;;  %1227 = vmatpush.bf16.msra.mxu1 %v2321_v50  ;;  %v3282_v4 = vpack.c.bf16 %v199_v28, %v193_v25  ;;  %v114_v45 = vunpack.c.l.bf16 %v55_v34  ;;  %v2238_v28 = vld [vmem:[%s4189_s0 + $0x138] sm:$0xf0] }
  0x5c   :  { %1272 = vmatpush.bf16.msra.mxu2 %v2377_v3  ;;  %v206_v25 = vmul.f32 %v3233_v22, %v109_v44  ;;  %v2241_v3 = vor.u32 %v2470_v56, %v2238_v28  ;;  %v61_v44 = vld [vmem:[%s4191_s2 + $0xb8] sm:$0xff] }
  0x5f   :  { %1184 = vmatpush.bf16.msra.mxu0 %v2249_v24  ;;  %1228 = vmatpush.bf16.msra.mxu1 %v2313_v21  ;;  %v2486_v21 = vld [vmem:[%s4189_s0 + $0x1b4] sm:$0xf] }
  0x63   :  { %1185 = vmatpush.bf16.msra.mxu0 %v2241_v3  ;;  %v2230_v3 = vld [vmem:[%s4189_s0 + $0x128] sm:$0xf0] }
  0x65   :  { %852 = vmatmul.bf16.gmra.mxu0 %v3037_v29  ;;  %896 = vmatmul.bf16.gmra.mxu1 %v3039_v30 }
  0x66   :  { %940 = vmatmul.bf16.gmra.mxu2 %v3041_v31  ;;  %984 = vmatmul.bf16.gmra.mxu3 %v3043_v32 }
  0x75   :  { %857 = vmatmul.bf16.gmra.mxu0 %v3087_v10  ;;  %901 = vmatmul.bf16.gmra.mxu1 %v3089_v11 }
  0x76   :  { %945 = vmatmul.bf16.gmra.mxu2 %v3091_v12  ;;  %989 = vmatmul.bf16.gmra.mxu3 %v3093_v13 }
  0x85   :  { %862 = vmatmul.bf16.gmra.mxu0 %v3137_v60  ;;  %906 = vmatmul.bf16.gmra.mxu1 %v3139_v61 }
  0x86   :  { %950 = vmatmul.bf16.gmra.mxu2 %v3141_v62  ;;  %994 = vmatmul.bf16.gmra.mxu3 %v3143_v63 }
  0x95   :  { %867 = vmatmul.bf16.gmra.mxu0 %v3193_v57  ;;  %911 = vmatmul.bf16.gmra.mxu1 %v3195_v58 }
  0x96   :  { %955 = vmatmul.bf16.gmra.mxu2 %v3197_v59  ;;  %999 = vmatmul.bf16.gmra.mxu3 %v3199_v0 }
  0xa5   :  { %1013 = vmatmul.bf16.vlgmr.msrb.gmra.mxu0 %v3239_v35  ;;  %2418 = vmatmul.msk.bf16.vlgmr.msrb.gmra.mxu1 %vm807_vm4, %v3241_v36 }
  0xa6   :  { %1101 = vmatmul.bf16.vlgmr.msrb.gmra.mxu2 %v2881_v37  ;;  %1145 = vmatmul.bf16.vlgmr.msrb.gmra.mxu3 %v2883_v38  ;;  %v97_v37 = vunpack.c.h.bf16 %v46_v43  ;;  %v103_v38 = vunpack.c.h.bf16 %v49_v46  ;;  %v115_v46 = vunpack.c.h.bf16 %v55_v34 }
  0xa8   :  { %v194_v1 = vmul.f32 %v3233_v22, %v97_v37  ;;  %v200_v2 = vmul.f32 %v3233_v22, %v103_v38  ;;  %v2366_v37 = vld [vmem:[%s4189_s0 + $0x238] sm:$0xf0]  ;;  %v211_v38 = vmul.f32 %v3230_v16, %v114_v45  ;;  %v212_v26 = vmul.f32 %v3233_v22, %v115_v46 }
  0xa9   :  { %v2369_v27 = vor.u32 %v2502_v55, %v2366_v37 }
  0xaa   :  { %v3284_v5 = vpack.c.bf16 %v200_v2, %v194_v1  ;;  %v2512_v1 = vld [vmem:[%s4189_s0 + $0x284] sm:$0xf]  ;;  %v2406_v2 = vld [vmem:[%s4189_s0 + $0x288] sm:$0xf0]  ;;  %v3335_v19 = vpack.c.bf16 %v212_v26, %v206_v25 }
  0xab   :  { %1273 = vmatpush.bf16.msra.mxu2 %v2369_v27  ;;  %v2358_v25 = vld [vmem:[%s4189_s0 + $0x228] sm:$0xf0]  ;;  %v2468_v26 = vld [vmem:[%s4189_s0 + $0x124] sm:$0xf] }
  0xb2   :  { %v838_v14 = vpop.f32.mrf.mxu0  ;;  %v882_v15 = vpop.f32.mrf.mxu1 }
  0xb3   :  { %v883_v17 = vadd.f32 %v882_v15, %v838_v14  ;;  %v2409_v14 = vor.u32 %v2512_v1, %v2406_v2 }
  0xb5   :  { %1018 = vmatmul.bf16.gmra.mxu0 %v3282_v4  ;;  %2419 = vmatmul.msk.bf16.gmra.mxu1 %vm807_vm4, %v3284_v5 }
  0xb6   :  { %1106 = vmatmul.bf16.gmra.mxu2 %v2931_v6  ;;  %1150 = vmatmul.bf16.gmra.mxu3 %v2933_v7  ;;  %v205_v7 = vmul.f32 %v3230_v16, %v108_v41  ;;  %v2302_v41 = vld [vmem:[%s4189_s0 + $0x1b8] sm:$0xf0] }
  0xb7   :  { %1320 = vmatpush.bf16.msra.mxu3 %v2409_v14  ;;  %v2484_v14 = vld [vmem:[%s4189_s0 + $0x1a4] sm:$0xf] }
  0xb8   :  { %v3333_v18 = vpack.c.bf16 %v211_v38, %v205_v7 }
  0xb9   :  { %v926_v42 = vpop.f32.mrf.mxu2  ;;  %v970_v43 = vpop.f32.mrf.mxu3 }
  0xba   :  { %v927_v47 = vadd.f32 %v926_v42, %v883_v17  ;;  %v840_v48 = vpop.f32.mrf.mxu0  ;;  %v884_v49 = vpop.f32.mrf.mxu1  ;;  %v58_v42 = vld [vmem:[%s4191_s2 + $0xa0] sm:$0xff] }
  0xbb   :  { %v885_v50 = vadd.f32 %v884_v49, %v840_v48  ;;  %v120_v45 = vunpack.c.l.bf16 %v58_v42  ;;  %v121_v48 = vunpack.c.h.bf16 %v58_v42  ;;  %v126_v49 = vunpack.c.l.bf16 %v61_v44 }
  0xbc   :  { %v3309_v6 = vadd.f32 %v970_v43, %v927_v47  ;;  %v2305_v43 = vor.u32 %v2486_v21, %v2302_v41 }
  0xbd   :  { %v223_v27 = vmul.f32 %v3230_v16, %v126_v49  ;;  %v218_v28 = vmul.f32 %v3233_v22, %v121_v48 }
  0xbe   :  { %1229 = vmatpush.bf16.msra.mxu1 %v2305_v43 }
  0xc1   :  { %v928_v15 = vpop.f32.mrf.mxu2  ;;  %v972_v17 = vpop.f32.mrf.mxu3 }
  0xc2   :  { %v929_v20 = vadd.f32 %v928_v15, %v885_v50  ;;  %v843_v23 = vpop.f32.mrf.mxu0  ;;  %v887_v24 = vpop.f32.mrf.mxu1  ;;  %v127_v50 = vunpack.c.h.bf16 %v61_v44  ;;  %v2294_v15 = vld [vmem:[%s4189_s0 + $0x1a8] sm:$0xf0] }
  0xc3   :  { %v888_v33 = vadd.f32 %v887_v24, %v843_v23 }
  0xc4   :  { %v3337_v34 = vadd.f32 %v972_v17, %v929_v20  ;;  %v224_v1 = vmul.f32 %v3233_v22, %v127_v50  ;;  %v2233_v17 = vor.u32 %v2468_v26, %v2230_v3  ;;  %v2297_v20 = vor.u32 %v2484_v14, %v2294_v15  ;;  %v2222_v15 = vld [vmem:[%s4189_s0 + $0x118] sm:$0xf0] }
  0xc5   :  { %1023 = vmatmul.bf16.gmra.mxu0 %v3333_v18  ;;  %2420 = vmatmul.msk.bf16.gmra.mxu1 %vm807_vm4, %v3335_v19 }
  0xc6   :  { %1111 = vmatmul.bf16.gmra.mxu2 %v2987_v51  ;;  %1155 = vmatmul.bf16.gmra.mxu3 %v2989_v52  ;;  %v217_v51 = vmul.f32 %v3230_v16, %v120_v45  ;;  %v2500_v52 = vld [vmem:[%s4189_s0 + $0x224] sm:$0xf]  ;;  %v3382_v21 = vpack.c.bf16 %v224_v1, %v218_v28  ;;  %v2466_v28 = vld [vmem:[%s4189_s0 + $0x114] sm:$0xf] }
  0xc7   :  { %v2361_v2 = vor.u32 %v2500_v52, %v2358_v25  ;;  %1186 = vmatpush.bf16.msra.mxu0 %v2233_v17  ;;  %1230 = vmatpush.bf16.msra.mxu1 %v2297_v20  ;;  %v2482_v17 = vld [vmem:[%s4189_s0 + $0x194] sm:$0xf]  ;;  %v2286_v20 = vld [vmem:[%s4189_s0 + $0x198] sm:$0xf0] }
  0xc9   :  { %v931_v46 = vpop.f32.mrf.mxu2  ;;  %v975_v47 = vpop.f32.mrf.mxu3  ;;  %1274 = vmatpush.bf16.msra.mxu2 %v2361_v2 }
  0xca   :  { %v932_v7 = vadd.f32 %v931_v46, %v888_v33  ;;  %v845_v55 = vpop.f32.mrf.mxu0  ;;  %v889_v37 = vpop.f32.mrf.mxu1  ;;  %v3380_v33 = vpack.c.bf16 %v223_v27, %v217_v51  ;;  %v64_v46 = vld [vmem:[%s4191_s2 + $0xd0] sm:$0xff]  ;;  %v2350_v27 = vld [vmem:[%s4189_s0 + $0x218] sm:$0xf0] }
  0xcb   :  { %v890_v56 = vadd.f32 %v889_v37, %v845_v55  ;;  %v132_v48 = vunpack.c.l.bf16 %v64_v46 }
  0xcc   :  { %v3356_v38 = vadd.f32 %v975_v47, %v932_v7  ;;  %v67_v47 = vld [vmem:[%s4191_s2 + $0xe8] sm:$0xff]  ;;  %v133_v7 = vunpack.c.h.bf16 %v64_v46 }
  0xcd   :  { %v138_v55 = vunpack.c.l.bf16 %v67_v47  ;;  %v139_v37 = vunpack.c.h.bf16 %v67_v47 }
  0xce   :  { %v230_v2 = vmul.f32 %v3233_v22, %v133_v7  ;;  %v70_v7 = vld [vmem:[%s4191_s2 + $0x100] sm:$0xff] }
  0xcf   :  { %v235_v1 = vmul.f32 %v3230_v16, %v138_v55  ;;  %v236_v3 = vmul.f32 %v3233_v22, %v139_v37  ;;  %v73_v55 = vld [vmem:[%s4191_s2 + $0x118] sm:$0xff]  ;;  %v2496_v37 = vld [vmem:[%s4189_s0 + $0x204] sm:$0xf] }
  0xd1   :  { %v933_v23 = vpop.f32.mrf.mxu2  ;;  %v977_v24 = vpop.f32.mrf.mxu3 }
  0xd2   :  { %v934_v41 = vadd.f32 %v933_v23, %v890_v56  ;;  %v848_v42 = vpop.f32.mrf.mxu0  ;;  %v892_v43 = vpop.f32.mrf.mxu1  ;;  %v2225_v23 = vor.u32 %v2466_v28, %v2222_v15  ;;  %v2464_v15 = vld [vmem:[%s4189_s0 + $0x104] sm:$0xf] }
  0xd3   :  { %v893_v44 = vadd.f32 %v892_v43, %v848_v42 }
  0xd4   :  { %v3384_v45 = vadd.f32 %v977_v24, %v934_v41  ;;  %v2289_v24 = vor.u32 %v2482_v17, %v2286_v20  ;;  %1187 = vmatpush.bf16.msra.mxu0 %v2225_v23  ;;  %v2214_v17 = vld [vmem:[%s4189_s0 + $0x108] sm:$0xf0]  ;;  %v2480_v20 = vld [vmem:[%s4189_s0 + $0x184] sm:$0xf] }
  0xd5   :  { %1028 = vmatmul.bf16.gmra.mxu0 %v3380_v33  ;;  %2421 = vmatmul.msk.bf16.gmra.mxu1 %vm807_vm4, %v3382_v21 }
  0xd6   :  { %1116 = vmatmul.bf16.gmra.mxu2 %v3037_v29  ;;  %1160 = vmatmul.bf16.gmra.mxu3 %v3039_v30  ;;  %v229_v29 = vmul.f32 %v3230_v16, %v132_v48  ;;  %v2498_v30 = vld [vmem:[%s4189_s0 + $0x214] sm:$0xf] }
  0xd7   :  { %v2353_v14 = vor.u32 %v2498_v30, %v2350_v27  ;;  %1231 = vmatpush.bf16.msra.mxu1 %v2289_v24  ;;  %v145_v30 = vunpack.c.h.bf16 %v70_v7  ;;  %v151_v27 = vunpack.c.h.bf16 %v73_v55 }
  0xd8   :  { %v3421_v43 = vpack.c.bf16 %v235_v1, %v229_v29 }
  0xd9   :  { %v936_v49 = vpop.f32.mrf.mxu2  ;;  %v980_v50 = vpop.f32.mrf.mxu3  ;;  %1275 = vmatpush.bf16.msra.mxu2 %v2353_v14  ;;  %v242_v24 = vmul.f32 %v3233_v22, %v145_v30  ;;  %v79_v30 = vld [vmem:[%s4191_s2 + $0x148] sm:$0xff] }
  0xda   :  { %v937_v56 = vadd.f32 %v936_v49, %v893_v44  ;;  %v850_v51 = vpop.f32.mrf.mxu0  ;;  %v894_v52 = vpop.f32.mrf.mxu1  ;;  %v3423_v44 = vpack.c.bf16 %v236_v3, %v230_v2 }
  0xdb   :  { %v895_v25 = vadd.f32 %v894_v52, %v850_v51  ;;  %v144_v52 = vunpack.c.l.bf16 %v70_v7 }
  0xdc   :  { %v3397_v26 = vadd.f32 %v980_v50, %v937_v56  ;;  %v2342_v56 = vld [vmem:[%s4189_s0 + $0x208] sm:$0xf0] }
  0xdd   :  { %v2345_v51 = vor.u32 %v2496_v37, %v2342_v56  ;;  %v241_v14 = vmul.f32 %v3230_v16, %v144_v52 }
  0xdf   :  { %1276 = vmatpush.bf16.msra.mxu2 %v2345_v51 }
  0xe1   :  { %v938_v41 = vpop.f32.mrf.mxu2  ;;  %v982_v42 = vpop.f32.mrf.mxu3 }
  0xe2   :  { %v939_v46 = vadd.f32 %v938_v41, %v895_v25  ;;  %v853_v47 = vpop.f32.mrf.mxu0  ;;  %v897_v48 = vpop.f32.mrf.mxu1  ;;  %v248_v41 = vmul.f32 %v3233_v22, %v151_v27 }
  0xe3   :  { %v898_v49 = vadd.f32 %v897_v48, %v853_v47 }
  0xe4   :  { %v3425_v50 = vadd.f32 %v982_v42, %v939_v46  ;;  %v2217_v42 = vor.u32 %v2464_v15, %v2214_v17  ;;  %v2278_v46 = vld [vmem:[%s4189_s0 + $0x188] sm:$0xf0] }
  0xe5   :  { %1033 = vmatmul.bf16.gmra.mxu0 %v3421_v43  ;;  %2422 = vmatmul.msk.bf16.gmra.mxu1 %vm807_vm4, %v3423_v44  ;;  %v2281_v47 = vor.u32 %v2480_v20, %v2278_v46 }
  0xe6   :  { %1121 = vmatmul.bf16.gmra.mxu2 %v3087_v10  ;;  %1165 = vmatmul.bf16.gmra.mxu3 %v3089_v11  ;;  %v150_v10 = vunpack.c.l.bf16 %v73_v55  ;;  %v3464_v55 = vpack.c.bf16 %v248_v41, %v242_v24 }
  0xe7   :  { %1188 = vmatpush.bf16.msra.mxu0 %v2217_v42  ;;  %1232 = vmatpush.bf16.msra.mxu1 %v2281_v47 }
  0xe8   :  { %v247_v23 = vmul.f32 %v3230_v16, %v150_v10 }
  0xe9   :  { %v941_v25 = vpop.f32.mrf.mxu2  ;;  %v985_v29 = vpop.f32.mrf.mxu3 }
  0xea   :  { %v942_v11 = vadd.f32 %v941_v25, %v898_v49  ;;  %v855_v28 = vpop.f32.mrf.mxu0  ;;  %v899_v1 = vpop.f32.mrf.mxu1  ;;  %v3462_v7 = vpack.c.bf16 %v247_v23, %v241_v14 }
  0xeb   :  { %v900_v2 = vadd.f32 %v899_v1, %v855_v28  ;;  %v162_v1 = vunpack.c.l.bf16 %v79_v30 }
  0xec   :  { %v3444_v3 = vadd.f32 %v985_v29, %v942_v11  ;;  %v76_v29 = vld [vmem:[%s4191_s2 + $0x130] sm:$0xff] }
  0xed   :  { %v156_v11 = vunpack.c.l.bf16 %v76_v29  ;;  %v157_v28 = vunpack.c.h.bf16 %v76_v29  ;;  %v259_v23 = vmul.f32 %v3230_v16, %v162_v1 }
  0xef   :  { %v254_v24 = vmul.f32 %v3233_v22, %v157_v28 }
  0xf1   :  { %v943_v48 = vpop.f32.mrf.mxu2  ;;  %v987_v49 = vpop.f32.mrf.mxu3 }
  0xf2   :  { %v944_v37 = vadd.f32 %v943_v48, %v900_v2  ;;  %v858_v56 = vpop.f32.mrf.mxu0  ;;  %v902_v51 = vpop.f32.mrf.mxu1  ;;  %v163_v2 = vunpack.c.h.bf16 %v79_v30 }
  0xf3   :  { %v903_v52 = vadd.f32 %v902_v51, %v858_v56 }
  0xf4   :  { %v3466_v25 = vadd.f32 %v987_v49, %v944_v37  ;;  %v260_v41 = vmul.f32 %v3233_v22, %v163_v2 }
  0xf5   :  { %1038 = vmatmul.bf16.gmra.mxu0 %v3462_v7  ;;  %2423 = vmatmul.msk.bf16.gmra.mxu1 %vm807_vm4, %v3464_v55 }
  0xf6   :  { %1126 = vmatmul.bf16.gmra.mxu2 %v3137_v60  ;;  %1170 = vmatmul.bf16.gmra.mxu3 %v3139_v61  ;;  %v253_v61 = vmul.f32 %v3230_v16, %v156_v11  ;;  %v3487_v48 = vpack.c.bf16 %v260_v41, %v254_v24 }
  0xf8   :  { %v3485_v47 = vpack.c.bf16 %v259_v23, %v253_v61 }
  0xf9   :  { %v946_v10 = vpop.f32.mrf.mxu2  ;;  %v990_v27 = vpop.f32.mrf.mxu3 }
  0xfa   :  { %v947_v14 = vadd.f32 %v946_v10, %v903_v52  ;;  %v860_v15 = vpop.f32.mrf.mxu0  ;;  %v904_v17 = vpop.f32.mrf.mxu1 }
  0xfb   :  { %v905_v60 = vadd.f32 %v904_v17, %v860_v15 }
  0xfc   :  { %v3479_v20 = vadd.f32 %v990_v27, %v947_v14 }
 0x101   :  { %v948_v42 = vpop.f32.mrf.mxu2  ;;  %v992_v46 = vpop.f32.mrf.mxu3 }
 0x102   :  { %v949_v49 = vadd.f32 %v948_v42, %v905_v60  ;;  %v863_v37 = vpop.f32.mrf.mxu0  ;;  %v907_v56 = vpop.f32.mrf.mxu1 }
 0x103   :  { %v908_v51 = vadd.f32 %v907_v56, %v863_v37 }
 0x104   :  { %v3489_v52 = vadd.f32 %v992_v46, %v949_v49 }
 0x105   :  { %1043 = vmatmul.bf16.gmra.mxu0 %v3485_v47  ;;  %2424 = vmatmul.msk.bf16.gmra.mxu1 %vm807_vm4, %v3487_v48 }
 0x106   :  { %1131 = vmatmul.bf16.gmra.mxu2 %v3193_v57  ;;  %1175 = vmatmul.bf16.gmra.mxu3 %v3195_v58 }
 0x109   :  { %v951_v16 = vpop.f32.mrf.mxu2  ;;  %v995_v22 = vpop.f32.mrf.mxu3 }
 0x10a   :  { %v952_v29 = vadd.f32 %v951_v16, %v908_v51  ;;  %v865_v30 = vpop.f32.mrf.mxu0  ;;  %v909_v10 = vpop.f32.mrf.mxu1 }
 0x10b   :  { %v910_v27 = vadd.f32 %v909_v10, %v865_v30 }
 0x10c   :  { %v3496_v11 = vadd.f32 %v995_v22, %v952_v29 }
 0x111   :  { %v953_v28 = vpop.f32.mrf.mxu2  ;;  %v997_v1 = vpop.f32.mrf.mxu3 }
 0x112   :  { %v954_v2 = vadd.f32 %v953_v28, %v910_v27  ;;  %v868_v14 = vpop.f32.mrf.mxu0  ;;  %v912_v15 = vpop.f32.mrf.mxu1 }
 0x113   :  { %v913_v17 = vadd.f32 %v912_v15, %v868_v14 }
 0x114   :  { %v3498_v60 = vadd.f32 %v997_v1, %v954_v2 }
 0x115   :  { %1189 = vmatmul.bf16.vlgmr.msra.gmra.mxu0 %v2885_v39  ;;  %1233 = vmatmul.bf16.vlgmr.msra.gmra.mxu1 %v2887_v40 }
 0x116   :  { %1277 = vmatmul.bf16.vlgmr.msra.gmra.mxu2 %v3239_v35  ;;  %2425 = vmatmul.msk.bf16.vlgmr.msra.gmra.mxu3 %vm807_vm4, %v3241_v36 }
 0x119   :  { %v956_v57 = vpop.f32.mrf.mxu2  ;;  %v1000_v58 = vpop.f32.mrf.mxu3 }
 0x11a   :  { %v957_v61 = vadd.f32 %v956_v57, %v913_v17  ;;  %v870_v23 = vpop.f32.mrf.mxu0  ;;  %v914_v24 = vpop.f32.mrf.mxu1 }
 0x11b   :  { %v915_v41 = vadd.f32 %v914_v24, %v870_v23 }
 0x11c   :  { %v3505_v42 = vadd.f32 %v1000_v58, %v957_v61 }
 0x121   :  { %v958_v46 = vpop.f32.mrf.mxu2  ;;  %v1002_v49 = vpop.f32.mrf.mxu3 }
 0x122   :  { %v959_v37 = vadd.f32 %v958_v46, %v915_v41  ;;  %v1014_v56 = vpop.f32.mrf.mxu0  ;;  %v1058_v39 = vpop.f32.mrf.mxu1 }
 0x123   :  { %v1015_v40 = vadd.f32 %v1014_v56, %v3309_v6 }
 0x124   :  { %v3508_v51 = vadd.f32 %v1002_v49, %v959_v37 }
 0x125   :  { %v3510_v35 = vadd.f32 %v1058_v39, %v1015_v40  ;;  %1194 = vmatmul.bf16.gmra.mxu0 %v2935_v8  ;;  %1238 = vmatmul.bf16.gmra.mxu1 %v2937_v9 }
 0x126   :  { %1282 = vmatmul.bf16.gmra.mxu2 %v3282_v4  ;;  %2426 = vmatmul.msk.bf16.gmra.mxu3 %vm807_vm4, %v3284_v5 }
 0x129   :  { %v1102_v36 = vpop.f32.mrf.mxu2  ;;  %v1146_v16 = vpop.f32.mrf.mxu3 }
 0x12a   :  { %v3517_v22 = vadd.f32 %v1146_v16, %v1102_v36  ;;  %v1016_v29 = vpop.f32.mrf.mxu0  ;;  %v1060_v30 = vpop.f32.mrf.mxu1 }
 0x12b   :  { %v1017_v6 = vadd.f32 %v1016_v29, %v3337_v34 }
 0x12d   :  { %v3520_v10 = vadd.f32 %v1060_v30, %v1017_v6 }
 0x131   :  { %v1104_v27 = vpop.f32.mrf.mxu2  ;;  %v1148_v28 = vpop.f32.mrf.mxu3 }
 0x132   :  { %v3522_v8 = vadd.f32 %v1148_v28, %v1104_v27  ;;  %v1019_v9 = vpop.f32.mrf.mxu0  ;;  %v1063_v1 = vpop.f32.mrf.mxu1 }
 0x133   :  { %v1020_v4 = vadd.f32 %v1019_v9, %v3356_v38 }
 0x135   :  { %v3525_v2 = vadd.f32 %v1063_v1, %v1020_v4  ;;  %1199 = vmatmul.bf16.gmra.mxu0 %v2991_v53  ;;  %1243 = vmatmul.bf16.gmra.mxu1 %v2993_v54 }
 0x136   :  { %1287 = vmatmul.bf16.gmra.mxu2 %v3333_v18  ;;  %2427 = vmatmul.msk.bf16.gmra.mxu3 %vm807_vm4, %v3335_v19 }
 0x139   :  { %v1107_v5 = vpop.f32.mrf.mxu2  ;;  %v1151_v34 = vpop.f32.mrf.mxu3 }
 0x13a   :  { %v3532_v14 = vadd.f32 %v1151_v34, %v1107_v5  ;;  %v1021_v15 = vpop.f32.mrf.mxu0  ;;  %v1065_v17 = vpop.f32.mrf.mxu1 }
 0x13b   :  { %v1022_v57 = vadd.f32 %v1021_v15, %v3384_v45 }
 0x13d   :  { %v3535_v38 = vadd.f32 %v1065_v17, %v1022_v57 }
 0x141   :  { %v1109_v58 = vpop.f32.mrf.mxu2  ;;  %v1153_v61 = vpop.f32.mrf.mxu3 }
 0x142   :  { %v3537_v53 = vadd.f32 %v1153_v61, %v1109_v58  ;;  %v1024_v54 = vpop.f32.mrf.mxu0  ;;  %v1068_v23 = vpop.f32.mrf.mxu1 }
 0x143   :  { %v1025_v18 = vadd.f32 %v1024_v54, %v3397_v26 }
 0x145   :  { %v3540_v24 = vadd.f32 %v1068_v23, %v1025_v18  ;;  %1204 = vmatmul.bf16.gmra.mxu0 %v3041_v31  ;;  %1248 = vmatmul.bf16.gmra.mxu1 %v3043_v32 }
 0x146   :  { %1292 = vmatmul.bf16.gmra.mxu2 %v3380_v33  ;;  %2428 = vmatmul.msk.bf16.gmra.mxu3 %vm807_vm4, %v3382_v21 }
 0x149   :  { %v1112_v19 = vpop.f32.mrf.mxu2  ;;  %v1156_v45 = vpop.f32.mrf.mxu3 }
 0x14a   :  { %v3547_v41 = vadd.f32 %v1156_v45, %v1112_v19  ;;  %v1026_v46 = vpop.f32.mrf.mxu0  ;;  %v1070_v49 = vpop.f32.mrf.mxu1 }
 0x14b   :  { %v1027_v37 = vadd.f32 %v1026_v46, %v3425_v50 }
 0x14d   :  { %v3550_v26 = vadd.f32 %v1070_v49, %v1027_v37 }
 0x151   :  { %v1114_v56 = vpop.f32.mrf.mxu2  ;;  %v1158_v39 = vpop.f32.mrf.mxu3 }
 0x152   :  { %v3552_v31 = vadd.f32 %v1158_v39, %v1114_v56  ;;  %v1029_v32 = vpop.f32.mrf.mxu0  ;;  %v1073_v40 = vpop.f32.mrf.mxu1 }
 0x153   :  { %v1030_v33 = vadd.f32 %v1029_v32, %v3444_v3 }
 0x155   :  { %v3555_v36 = vadd.f32 %v1073_v40, %v1030_v33  ;;  %1209 = vmatmul.bf16.gmra.mxu0 %v3091_v12  ;;  %1253 = vmatmul.bf16.gmra.mxu1 %v3093_v13 }
 0x156   :  { %1297 = vmatmul.bf16.gmra.mxu2 %v3421_v43  ;;  %2429 = vmatmul.msk.bf16.gmra.mxu3 %vm807_vm4, %v3423_v44 }
 0x159   :  { %v1117_v21 = vpop.f32.mrf.mxu2  ;;  %v1161_v50 = vpop.f32.mrf.mxu3 }
 0x15a   :  { %v3562_v16 = vadd.f32 %v1161_v50, %v1117_v21  ;;  %v1031_v29 = vpop.f32.mrf.mxu0  ;;  %v1075_v30 = vpop.f32.mrf.mxu1 }
 0x15b   :  { %v1032_v6 = vadd.f32 %v1031_v29, %v3466_v25 }
 0x15d   :  { %v3565_v3 = vadd.f32 %v1075_v30, %v1032_v6 }
 0x161   :  { %v1119_v27 = vpop.f32.mrf.mxu2  ;;  %v1163_v28 = vpop.f32.mrf.mxu3 }
 0x162   :  { %v3567_v12 = vadd.f32 %v1163_v28, %v1119_v27  ;;  %v1034_v13 = vpop.f32.mrf.mxu0  ;;  %v1078_v9 = vpop.f32.mrf.mxu1 }
 0x163   :  { %v1035_v43 = vadd.f32 %v1034_v13, %v3479_v20 }
 0x165   :  { %v3570_v1 = vadd.f32 %v1078_v9, %v1035_v43  ;;  %1214 = vmatmul.bf16.gmra.mxu0 %v3141_v62  ;;  %1258 = vmatmul.bf16.gmra.mxu1 %v3143_v63 }
 0x166   :  { %1302 = vmatmul.bf16.gmra.mxu2 %v3462_v7  ;;  %2430 = vmatmul.msk.bf16.gmra.mxu3 %vm807_vm4, %v3464_v55 }
 0x169   :  { %v1122_v44 = vpop.f32.mrf.mxu2  ;;  %v1166_v25 = vpop.f32.mrf.mxu3 }
 0x16a   :  { %v3577_v4 = vadd.f32 %v1166_v25, %v1122_v44  ;;  %v1036_v5 = vpop.f32.mrf.mxu0  ;;  %v1080_v34 = vpop.f32.mrf.mxu1 }
 0x16b   :  { %v1037_v15 = vadd.f32 %v1036_v5, %v3489_v52 }
 0x16d   :  { %v3580_v20 = vadd.f32 %v1080_v34, %v1037_v15 }
 0x171   :  { %v1124_v17 = vpop.f32.mrf.mxu2  ;;  %v1168_v57 = vpop.f32.mrf.mxu3 }
 0x172   :  { %v3582_v62 = vadd.f32 %v1168_v57, %v1124_v17  ;;  %v1039_v63 = vpop.f32.mrf.mxu0  ;;  %v1083_v58 = vpop.f32.mrf.mxu1 }
 0x173   :  { %v1040_v7 = vadd.f32 %v1039_v63, %v3496_v11 }
 0x175   :  { %v3585_v61 = vadd.f32 %v1083_v58, %v1040_v7  ;;  %1219 = vmatmul.bf16.gmra.mxu0 %v3197_v59  ;;  %1263 = vmatmul.bf16.gmra.mxu1 %v3199_v0 }
 0x176   :  { %1307 = vmatmul.bf16.gmra.mxu2 %v3485_v47  ;;  %2431 = vmatmul.msk.bf16.gmra.mxu3 %vm807_vm4, %v3487_v48 }
 0x179   :  { %v1127_v55 = vpop.f32.mrf.mxu2  ;;  %v1171_v52 = vpop.f32.mrf.mxu3 }
 0x17a   :  { %v3592_v54 = vadd.f32 %v1171_v52, %v1127_v55  ;;  %v1041_v23 = vpop.f32.mrf.mxu0  ;;  %v1085_v18 = vpop.f32.mrf.mxu1 }
 0x17b   :  { %v1042_v19 = vadd.f32 %v1041_v23, %v3498_v60 }
 0x17d   :  { %v3595_v11 = vadd.f32 %v1085_v18, %v1042_v19 }
 0x17f   :  { %4203 = vst [vmem:[#allocation2_spill] sm:$0xff] %v3595_v11 }
 0x181   :  { %v1129_v45 = vpop.f32.mrf.mxu2  ;;  %v1173_v46 = vpop.f32.mrf.mxu3 }
 0x182   :  { %v3597_v59 = vadd.f32 %v1173_v46, %v1129_v45  ;;  %v1044_v0 = vpop.f32.mrf.mxu0  ;;  %v1088_v49 = vpop.f32.mrf.mxu1 }
 0x183   :  { %v1045_v47 = vadd.f32 %v1044_v0, %v3505_v42 }
 0x185   :  { %v3600_v37 = vadd.f32 %v1088_v49, %v1045_v47 }
 0x187   :  { %4204 = vst [vmem:[#allocation3_spill] sm:$0xff] %v3600_v37 }
 0x189   :  { %v1132_v48 = vpop.f32.mrf.mxu2  ;;  %v1176_v56 = vpop.f32.mrf.mxu3 }
 0x18a   :  { %v3602_v39 = vadd.f32 %v1176_v56, %v1132_v48  ;;  %v1046_v32 = vpop.f32.mrf.mxu0  ;;  %v1090_v40 = vpop.f32.mrf.mxu1 }
 0x18b   :  { %v1047_v60 = vadd.f32 %v1046_v32, %v3508_v51 }
 0x18d   :  { %v3605_v33 = vadd.f32 %v1090_v40, %v1047_v60 }
 0x18f   :  { %4205 = vst [vmem:[#allocation4_spill] sm:$0xff] %v3605_v33 }
 0x191   :  { %v1134_v21 = vpop.f32.mrf.mxu2  ;;  %v1178_v50 = vpop.f32.mrf.mxu3 }
 0x192   :  { %v3607_v29 = vadd.f32 %v1178_v50, %v1134_v21  ;;  %v1190_v30 = vpop.f32.mrf.mxu0  ;;  %v1234_v6 = vpop.f32.mrf.mxu1  ;;  %v1416_v21 = vmul.f32 %v3520_v10, %v3520_v10 }
 0x193   :  { %v1191_v42 = vadd.f32 %v1190_v30, %v3517_v22  ;;  %v1414_v22 = vmul.f32 %v3510_v35, %v3510_v35 }
 0x195   :  { %v1235_v27 = vadd.f32 %v1234_v6, %v1191_v42 }
 0x199   :  { %v1278_v28 = vpop.f32.mrf.mxu2  ;;  %v1322_v13 = vpop.f32.mrf.mxu3 }
 0x19a   :  { %v1279_v9 = vadd.f32 %v1278_v28, %v1235_v27  ;;  %v1192_v43 = vpop.f32.mrf.mxu0  ;;  %v1236_v44 = vpop.f32.mrf.mxu1 }
 0x19b   :  { %v1193_v51 = vadd.f32 %v1192_v43, %v3522_v8 }
 0x19c   :  { %v3610_v25 = vadd.f32 %v1322_v13, %v1279_v9 }
 0x19d   :  { %v1237_v17 = vadd.f32 %v1236_v44, %v1193_v51 }
 0x19e   :  { %v1358_v5 = vsel %vm1357_vm5, %v3610_v25, 0.0  ;;  %v1415_v34 = vmul.f32 %v3610_v25, %v3610_v25 }
 0x19f   :  { %v1359_v15 = vadd.f32 %v1358_v5, %v3510_v35 }
 0x1a0   :  { %v1442_v57 = vsel %vm1357_vm5, %v1415_v34, 0.0  ;;  %v1418_v34 = vmul.f32 %v3525_v2, %v3525_v2 }
 0x1a1   :  { %v1280_v63 = vpop.f32.mrf.mxu2  ;;  %v1324_v58 = vpop.f32.mrf.mxu3  ;;  %1360 = vadd.xlane.f32.xlu0 %v1359_v15  ;;  %v1443_v7 = vadd.f32 %v1442_v57, %v1414_v22 }
 0x1a2   :  { %v1281_v55 = vadd.f32 %v1280_v63, %v1237_v17  ;;  %v1195_v8 = vpop.f32.mrf.mxu0  ;;  %v1239_v52 = vpop.f32.mrf.mxu1  ;;  %v1420_v17 = vmul.f32 %v3535_v38, %v3535_v38 }
 0x1a3   :  { %1444 = vadd.xlane.f32.xlu2 %v1443_v7  ;;  %v1196_v18 = vadd.f32 %v1195_v8, %v3532_v14 }
 0x1a4   :  { %v3621_v23 = vadd.f32 %v1324_v58, %v1281_v55 }
 0x1a5   :  { %v1240_v46 = vadd.f32 %v1239_v52, %v1196_v18 }
 0x1a6   :  { %v1362_v19 = vsel %vm1357_vm5, %v3621_v23, 0.0  ;;  %v1417_v0 = vmul.f32 %v3621_v23, %v3621_v23 }
 0x1a7   :  { %v1363_v45 = vadd.f32 %v1362_v19, %v3520_v10 }
 0x1a8   :  { %v1446_v14 = vsel %vm1357_vm5, %v1417_v0, 0.0 }
 0x1a9   :  { %v1283_v49 = vpop.f32.mrf.mxu2  ;;  %v1327_v47 = vpop.f32.mrf.mxu3  ;;  %1364 = vadd.xlane.f32.xlu0 %v1363_v45  ;;  %v1447_v6 = vadd.f32 %v1446_v14, %v1416_v21 }
 0x1aa   :  { %v1284_v48 = vadd.f32 %v1283_v49, %v1240_v46  ;;  %v1197_v56 = vpop.f32.mrf.mxu0  ;;  %v1241_v32 = vpop.f32.mrf.mxu1 }
 0x1ab   :  { %v1198_v60 = vadd.f32 %v1197_v56, %v3537_v53 }
 0x1ac   :  { %v3629_v40 = vadd.f32 %v1327_v47, %v1284_v48  ;;  %v1422_v47 = vmul.f32 %v3540_v24, %v3540_v24 }
 0x1ad   :  { %v1242_v42 = vadd.f32 %v1241_v32, %v1198_v60 }
 0x1ae   :  { %v1366_v50 = vsel %vm1357_vm5, %v3629_v40, 0.0  ;;  %v1419_v27 = vmul.f32 %v3629_v40, %v3629_v40 }
 0x1af   :  { %v1367_v30 = vadd.f32 %v1366_v50, %v3525_v2 }
 0x1b0   :  { %v1450_v5 = vsel %vm1357_vm5, %v1419_v27, 0.0 }
 0x1b1   :  { %v1285_v28 = vpop.f32.mrf.mxu2  ;;  %v1329_v13 = vpop.f32.mrf.mxu3  ;;  %1368 = vadd.xlane.f32.xlu1 %v1367_v30  ;;  %1448 = vadd.xlane.f32.xlu0 %v1447_v6  ;;  %v1451_v22 = vadd.f32 %v1450_v5, %v1418_v34 }
 0x1b2   :  { %v1286_v53 = vadd.f32 %v1285_v28, %v1242_v42  ;;  %v1200_v9 = vpop.f32.mrf.mxu0  ;;  %v1244_v43 = vpop.f32.mrf.mxu1 }
 0x1b3   :  { %v1201_v51 = vadd.f32 %v1200_v9, %v3547_v41 }
 0x1b4   :  { %v3640_v44 = vadd.f32 %v1329_v13, %v1286_v53  ;;  %v1424_v13 = vmul.f32 %v3550_v26, %v3550_v26 }
 0x1b5   :  { %v1245_v57 = vadd.f32 %v1244_v43, %v1201_v51 }
 0x1b6   :  { %v1421_v15 = vmul.f32 %v3640_v44, %v3640_v44  ;;  %v1370_v45 = vsel %vm1357_vm5, %v3640_v44, 0.0 }
 0x1b7   :  { %v1371_v49 = vadd.f32 %v1370_v45, %v3535_v38 }
 0x1b8   :  { %v1454_v63 = vsel %vm1357_vm5, %v1421_v15, 0.0 }
 0x1b9   :  { %v1288_v58 = vpop.f32.mrf.mxu2  ;;  %v1332_v7 = vpop.f32.mrf.mxu3  ;;  %1452 = vadd.xlane.f32.xlu1 %v1451_v22  ;;  %v1455_v55 = vadd.f32 %v1454_v63, %v1420_v17 }
 0x1ba   :  { %v1289_v41 = vadd.f32 %v1288_v58, %v1245_v57  ;;  %v1202_v8 = vpop.f32.mrf.mxu0  ;;  %v1246_v52 = vpop.f32.mrf.mxu1 }
 0x1bb   :  { %1456 = vadd.xlane.f32.xlu2 %v1455_v55  ;;  %v1203_v19 = vadd.f32 %v1202_v8, %v3552_v31  ;;  %v1426_v55 = vmul.f32 %v3555_v36, %v3555_v36 }
 0x1bc   :  { %v3651_v18 = vadd.f32 %v1332_v7, %v1289_v41 }
 0x1bd   :  { %v1247_v48 = vadd.f32 %v1246_v52, %v1203_v19 }
 0x1be   :  { %v1374_v46 = vsel %vm1357_vm5, %v3651_v18, 0.0  ;;  %v1423_v0 = vmul.f32 %v3651_v18, %v3651_v18 }
 0x1bf   :  { %v1375_v31 = vadd.f32 %v1374_v46, %v3540_v24 }
 0x1c0   :  { %v1458_v56 = vsel %vm1357_vm5, %v1423_v0, 0.0 }
 0x1c1   :  { %v1290_v32 = vpop.f32.mrf.mxu2  ;;  %v1334_v60 = vpop.f32.mrf.mxu3  ;;  %1372 = vadd.xlane.f32.xlu1 %v1371_v49  ;;  %v1459_v14 = vadd.f32 %v1458_v56, %v1422_v47 }
 0x1c2   :  { %v1291_v21 = vadd.f32 %v1290_v32, %v1247_v48  ;;  %v1205_v50 = vpop.f32.mrf.mxu0  ;;  %v1249_v30 = vpop.f32.mrf.mxu1 }
 0x1c3   :  { %1376 = vadd.xlane.f32.xlu2 %v1375_v31  ;;  %1460 = vadd.xlane.f32.xlu0 %v1459_v14  ;;  %v1206_v42 = vadd.f32 %v1205_v50, %v3562_v16 }
 0x1c4   :  { %v3665_v6 = vadd.f32 %v1334_v60, %v1291_v21  ;;  %v1428_v60 = vmul.f32 %v3565_v3, %v3565_v3 }
 0x1c5   :  { %v1250_v53 = vadd.f32 %v1249_v30, %v1206_v42 }
 0x1c6   :  { %v1425_v27 = vmul.f32 %v3665_v6, %v3665_v6  ;;  %v1378_v28 = vsel %vm1357_vm5, %v3665_v6, 0.0 }
 0x1c7   :  { %v1379_v34 = vadd.f32 %v1378_v28, %v3550_v26 }
 0x1c8   :  { %v1462_v9 = vsel %vm1357_vm5, %v1425_v27, 0.0 }
 0x1c9   :  { %v1293_v43 = vpop.f32.mrf.mxu2  ;;  %v1337_v51 = vpop.f32.mrf.mxu3  ;;  %v1463_v5 = vadd.f32 %v1462_v9, %v1424_v13 }
 0x1ca   :  { %v1294_v15 = vadd.f32 %v1293_v43, %v1250_v53  ;;  %v1207_v22 = vpop.f32.mrf.mxu0  ;;  %v1251_v16 = vpop.f32.mrf.mxu1 }
 0x1cb   :  { %1464 = vadd.xlane.f32.xlu1 %v1463_v5  ;;  %1380 = vadd.xlane.f32.xlu2 %v1379_v34  ;;  %v1208_v57 = vadd.f32 %v1207_v22, %v3567_v12 }
 0x1cc   :  { %v3676_v17 = vadd.f32 %v1337_v51, %v1294_v15  ;;  %v1430_v51 = vmul.f32 %v3570_v1, %v3570_v1 }
 0x1cd   :  { %v1252_v41 = vadd.f32 %v1251_v16, %v1208_v57 }
 0x1ce   :  { %v1382_v63 = vsel %vm1357_vm5, %v3676_v17, 0.0  ;;  %v1427_v58 = vmul.f32 %v3676_v17, %v3676_v17 }
 0x1cf   :  { %v1383_v7 = vadd.f32 %v1382_v63, %v3555_v36 }
 0x1d0   :  { %v1466_v8 = vsel %vm1357_vm5, %v1427_v58, 0.0 }
 0x1d1   :  { %v1295_v52 = vpop.f32.mrf.mxu2  ;;  %v1339_v19 = vpop.f32.mrf.mxu3  ;;  %1384 = vadd.xlane.f32.xlu0 %v1383_v7  ;;  %v1467_v45 = vadd.f32 %v1466_v8, %v1426_v55 }
 0x1d2   :  { %v1296_v46 = vadd.f32 %v1295_v52, %v1252_v41  ;;  %v1210_v12 = vpop.f32.mrf.mxu0  ;;  %v1254_v0 = vpop.f32.mrf.mxu1  ;;  %v1432_v52 = vmul.f32 %v3580_v20, %v3580_v20 }
 0x1d3   :  { %1468 = vadd.xlane.f32.xlu2 %v1467_v45  ;;  %v1211_v47 = vadd.f32 %v1210_v12, %v3577_v4 }
 0x1d4   :  { %v3687_v49 = vadd.f32 %v1339_v19, %v1296_v46 }
 0x1d5   :  { %v1255_v31 = vadd.f32 %v1254_v0, %v1211_v47 }
 0x1d6   :  { %v1386_v48 = vsel %vm1357_vm5, %v3687_v49, 0.0  ;;  %v1429_v56 = vmul.f32 %v3687_v49, %v3687_v49 }
 0x1d7   :  { %v1387_v32 = vadd.f32 %v1386_v48, %v3565_v3 }
 0x1d8   :  { %v1470_v14 = vsel %vm1357_vm5, %v1429_v56, 0.0 }
 0x1d9   :  { %v1298_v21 = vpop.f32.mrf.mxu2  ;;  %v1342_v50 = vpop.f32.mrf.mxu3  ;;  %1388 = vadd.xlane.f32.xlu1 %v1387_v32  ;;  %v1471_v30 = vadd.f32 %v1470_v14, %v1428_v60 }
 0x1da   :  { %v1299_v42 = vadd.f32 %v1298_v21, %v1255_v31  ;;  %v1212_v4 = vpop.f32.mrf.mxu0  ;;  %v1256_v27 = vpop.f32.mrf.mxu1  ;;  %v1434_v21 = vmul.f32 %v3585_v61, %v3585_v61 }
 0x1db   :  { %1472 = vadd.xlane.f32.xlu0 %v1471_v30  ;;  %v1213_v13 = vadd.f32 %v1212_v4, %v3582_v62 }
 0x1dc   :  { %v3698_v28 = vadd.f32 %v1342_v50, %v1299_v42 }
 0x1dd   :  { %v1257_v5 = vadd.f32 %v1256_v27, %v1213_v13 }
 0x1de   :  { %v1390_v53 = vsel %vm1357_vm5, %v3698_v28, 0.0  ;;  %v1431_v9 = vmul.f32 %v3698_v28, %v3698_v28 }
 0x1df   :  { %v1391_v43 = vadd.f32 %v1390_v53, %v3570_v1 }
 0x1e0   :  { %v1474_v34 = vsel %vm1357_vm5, %v1431_v9, 0.0 }
 0x1e1   :  { %v1300_v15 = vpop.f32.mrf.mxu2  ;;  %v1344_v22 = vpop.f32.mrf.mxu3  ;;  %1392 = vadd.xlane.f32.xlu2 %v1391_v43  ;;  %v1475_v16 = vadd.f32 %v1474_v34, %v1430_v51 }
 0x1e2   :  { %v1301_v57 = vadd.f32 %v1300_v15, %v1257_v5  ;;  %v1215_v62 = vpop.f32.mrf.mxu0  ;;  %v1259_v63 = vpop.f32.mrf.mxu1  ;;  %v1436_v15 = vmul.f32 %v3595_v11, %v3595_v11 }
 0x1e3   :  { %1476 = vadd.xlane.f32.xlu1 %v1475_v16  ;;  %v1216_v7 = vadd.f32 %v1215_v62, %v3592_v54 }
 0x1e4   :  { %v3709_v58 = vadd.f32 %v1344_v22, %v1301_v57 }
 0x1e5   :  { %v1260_v19 = vadd.f32 %v1259_v63, %v1216_v7 }
 0x1e6   :  { %v1394_v55 = vsel %vm1357_vm5, %v3709_v58, 0.0  ;;  %v1433_v41 = vmul.f32 %v3709_v58, %v3709_v58 }
 0x1e7   :  { %v1395_v8 = vadd.f32 %v1394_v55, %v3580_v20 }
 0x1e8   :  { %v1478_v45 = vsel %vm1357_vm5, %v1433_v41, 0.0 }
 0x1e9   :  { %v1303_v46 = vpop.f32.mrf.mxu2  ;;  %v1347_v12 = vpop.f32.mrf.mxu3  ;;  %1396 = vadd.xlane.f32.xlu0 %v1395_v8  ;;  %v1479_v0 = vadd.f32 %v1478_v45, %v1432_v52 }
 0x1ea   :  { %v1304_v47 = vadd.f32 %v1303_v46, %v1260_v19  ;;  %v1217_v54 = vpop.f32.mrf.mxu0  ;;  %v1261_v48 = vpop.f32.mrf.mxu1  ;;  %v1438_v46 = vmul.f32 %v3600_v37, %v3600_v37 }
 0x1eb   :  { %1480 = vadd.xlane.f32.xlu2 %v1479_v0  ;;  %v1218_v32 = vadd.f32 %v1217_v54, %v3597_v59 }
 0x1ec   :  { %v3720_v56 = vadd.f32 %v1347_v12, %v1304_v47 }
 0x1ed   :  { %v1262_v50 = vadd.f32 %v1261_v48, %v1218_v32 }
 0x1ee   :  { %4206 = vst [vmem:[#allocation5_spill] sm:$0xff] %v3720_v56  ;;  %v1398_v60 = vsel %vm1357_vm5, %v3720_v56, 0.0  ;;  %v1435_v31 = vmul.f32 %v3720_v56, %v3720_v56 }
 0x1ef   :  { %v1399_v14 = vadd.f32 %v1398_v60, %v3585_v61 }
 0x1f0   :  { %v1482_v30 = vsel %vm1357_vm5, %v1435_v31, 0.0 }
 0x1f1   :  { %v1305_v42 = vpop.f32.mrf.mxu2  ;;  %v1349_v4 = vpop.f32.mrf.mxu3  ;;  %1400 = vadd.xlane.f32.xlu1 %v1399_v14  ;;  %v1483_v27 = vadd.f32 %v1482_v30, %v1434_v21  ;;  %v1440_v21 = vmul.f32 %v3605_v33, %v3605_v33 }
 0x1f2   :  { %v1306_v13 = vadd.f32 %v1305_v42, %v1262_v50  ;;  %v1220_v59 = vpop.f32.mrf.mxu0  ;;  %v1264_v43 = vpop.f32.mrf.mxu1  ;;  %v1722_v42 = vld [vmem:[%s4192_s3] sm:$0xff]  ;;  %s2556_s3 = smov 1  }
 0x1f3   :  { %1484 = vadd.xlane.f32.xlu0 %v1483_v27  ;;  %v1221_v9 = vadd.f32 %v1220_v59, %v3602_v39 }
 0x1f4   :  { %v3731_v53 = vadd.f32 %v1349_v4, %v1306_v13 }
 0x1f5   :  { %v1265_v22 = vadd.f32 %v1264_v43, %v1221_v9 }
 0x1f6   :  { %4207 = vst [vmem:[#allocation6_spill] sm:$0xff] %v3731_v53  ;;  %v1402_v51 = vsel %vm1357_vm5, %v3731_v53, 0.0  ;;  %v1437_v5 = vmul.f32 %v3731_v53, %v3731_v53 }
 0x1f7   :  { %v1403_v34 = vadd.f32 %v1402_v51, %v3595_v11 }
 0x1f8   :  { %v1486_v16 = vsel %vm1357_vm5, %v1437_v5, 0.0 }
 0x1f9   :  { %v1308_v57 = vpop.f32.mrf.mxu2  ;;  %v1352_v62 = vpop.f32.mrf.mxu3  ;;  %1404 = vadd.xlane.f32.xlu2 %v1403_v34  ;;  %v1487_v63 = vadd.f32 %v1486_v16, %v1436_v15 }
 0x1fa   :  { %v1309_v39 = vadd.f32 %v1308_v57, %v1265_v22  ;;  %v1222_v7 = vpop.f32.mrf.mxu0  ;;  %v1266_v19 = vpop.f32.mrf.mxu1 }
 0x1fb   :  { %1488 = vadd.xlane.f32.xlu1 %v1487_v63  ;;  %v1223_v41 = vadd.f32 %v1222_v7, %v3607_v29 }
 0x1fc   :  { %v3742_v55 = vadd.f32 %v1352_v62, %v1309_v39 }
 0x1fd   :  { %v1267_v12 = vadd.f32 %v1266_v19, %v1223_v41 }
 0x1fe   :  { %4208 = vst [vmem:[#allocation7_spill] sm:$0xff] %v3742_v55  ;;  %v1406_v8 = vsel %vm1357_vm5, %v3742_v55, 0.0  ;;  %v1439_v52 = vmul.f32 %v3742_v55, %v3742_v55 }
 0x1ff   :  { %v1407_v45 = vadd.f32 %v1406_v8, %v3600_v37 }
 0x200   :  { %v1490_v0 = vsel %vm1357_vm5, %v1439_v52, 0.0 }
 0x201   :  { %v1310_v47 = vpop.f32.mrf.mxu2  ;;  %1408 = vadd.xlane.f32.xlu0 %v1407_v45  ;;  %v1491_v54 = vadd.f32 %v1490_v0, %v1438_v46  ;;  %v1354_v29 = vpop.f32.mrf.mxu3 }
 0x202   :  { %v1311_v48 = vadd.f32 %v1310_v47, %v1267_v12 }
 0x203   :  { %1492 = vadd.xlane.f32.xlu2 %v1491_v54 }
 0x204   :  { %v3753_v32 = vadd.f32 %v1354_v29, %v1311_v48 }
 0x206   :  { %4209 = vst [vmem:[#allocation8_spill] sm:$0xff] %v3753_v32  ;;  %v1410_v60 = vsel %vm1357_vm5, %v3753_v32, 0.0  ;;  %v1441_v31 = vmul.f32 %v3753_v32, %v3753_v32 }
 0x207   :  { %v1411_v14 = vadd.f32 %v1410_v60, %v3605_v33 }
 0x208   :  { %v1494_v50 = vsel %vm1357_vm5, %v1441_v31, 0.0 }
 0x209   :  { %1412 = vadd.xlane.f32.xlu1 %v1411_v14  ;;  %v1495_v30 = vadd.f32 %v1494_v50, %v1440_v21 }
 0x20b   :  { %1496 = vadd.xlane.f32.xlu0 %v1495_v30 }
 0x214   :  { %v1361_v13 = vpop.xlane.xlu0 %1360 }
 0x215   :  { %v3766_v43 = vmul.f32 0.0051020407, %v1361_v13 }
 0x216   :  { %v1445_v51 = vpop.xlane.xlu2 %1444 }
 0x217   :  { %v1526_v34 = vmul.f32 %v3766_v43, %v3766_v43  ;;  %v1512_v15 = vmul.f32 0.0051020407, %v1445_v51 }
 0x219   :  { %v1540_v22 = vsub.f32 %v1512_v15, %v1526_v34 }
 0x21b   :  { %v1554_v63 = vmax.f32 %v1540_v22, 0.0 }
 0x21c   :  { %v1365_v9 = vpop.xlane.xlu0 %1364 }
 0x21d   :  { %v3772_v62 = vmul.f32 0.0051020407, %v1365_v9  ;;  %v1568_v41 = vadd.f32 1e-05, %v1554_v63 }
 0x21f   :  { %v1527_v7 = vmul.f32 %v3772_v62, %v3772_v62  ;;  %2528 = vrsqrt.f32 %v1568_v41  ;;  %vm1588_vm7 = vweird.f32 %v1568_v41 }
 0x224   :  { %v1369_v4 = vpop.xlane.xlu1 %1368  ;;  %v1449_v16 = vpop.xlane.xlu0 %1448 }
 0x225   :  { %v1513_v39 = vmul.f32 0.0051020407, %v1449_v16  ;;  %v3778_v45 = vmul.f32 0.0051020407, %v1369_v4  ;;  %v2529_v60 = vpop.eup %2528 }
 0x226   :  { %v1583_v50 = vmul.f32 %v2529_v60, %v1568_v41  ;;  %vm1589_vm6 = vweird.f32 %v2529_v60 }
 0x227   :  { %v1541_v8 = vsub.f32 %v1513_v39, %v1527_v7  ;;  %v1528_v0 = vmul.f32 %v3778_v45, %v3778_v45  ;;  %vm1590_vm8 = vmor %vm1588_vm7, %vm1589_vm6 }
 0x228   :  { %v1584_v13 = vmul.f32 %v2529_v60, %v1583_v50 }
 0x229   :  { %v1555_v46 = vmax.f32 %v1541_v8, 0.0 }
 0x22a   :  { %v1585_v63 = vmul.f32 0.5, %v1584_v13 }
 0x22b   :  { %v3782_v47 = vadd.f32 1e-05, %v1555_v46 }
 0x22c   :  { %v1453_v27 = vpop.xlane.xlu1 %1452 }
 0x22d   :  { %v1514_v12 = vmul.f32 0.0051020407, %v1453_v27  ;;  %2530 = vrsqrt.f32 %v3782_v47  ;;  %vm1598_vm10 = vweird.f32 %v3782_v47 }
 0x22e   :  { %v1457_v52 = vpop.xlane.xlu2 %1456 }
 0x22f   :  { %v1542_v54 = vsub.f32 %v1514_v12, %v1528_v0  ;;  %v1515_v30 = vmul.f32 0.0051020407, %v1457_v52  ;;  %v1586_v0 = vsub.f32 1.5, %v1585_v63 }
 0x231   :  { %v1556_v14 = vmax.f32 %v1542_v54, 0.0 }
 0x233   :  { %v2531_v9 = vpop.eup %2530 }
 0x234   :  { %v1373_v59 = vpop.xlane.xlu1 %1372  ;;  %v1593_v22 = vmul.f32 %v2531_v9, %v3782_v47  ;;  %vm1599_vm9 = vweird.f32 %v2531_v9 }
 0x235   :  { %v3784_v48 = vmul.f32 0.0051020407, %v1373_v59  ;;  %vm1600_vm11 = vmor %vm1598_vm10, %vm1599_vm9 }
 0x236   :  { %v1377_v31 = vpop.xlane.xlu2 %1376  ;;  %v1461_v51 = vpop.xlane.xlu0 %1460  ;;  %v1594_v46 = vmul.f32 %v2531_v9, %v1593_v22 }
 0x237   :  { %v1529_v21 = vmul.f32 %v3784_v48, %v3784_v48  ;;  %v3793_v27 = vmul.f32 0.0051020407, %v1377_v31  ;;  %v1516_v39 = vmul.f32 0.0051020407, %v1461_v51 }
 0x239   :  { %v1543_v4 = vsub.f32 %v1515_v30, %v1529_v21  ;;  %v1530_v15 = vmul.f32 %v3793_v27, %v3793_v27  ;;  %v1587_v30 = vmul.f32 %v2529_v60, %v1586_v0 }
 0x23b   :  { %v1557_v34 = vmax.f32 %v1543_v4, 0.0  ;;  %v1544_v8 = vsub.f32 %v1516_v39, %v1530_v15  ;;  %v1595_v4 = vmul.f32 0.5, %v1594_v46  ;;  %v1591_v63 = vsel %vm1590_vm8, %v2529_v60, %v1587_v30 }
 0x23d   :  { %v3801_v7 = vadd.f32 1e-05, %v1557_v34  ;;  %v1558_v31 = vmax.f32 %v1544_v8, 0.0  ;;  %v1596_v8 = vsub.f32 1.5, %v1595_v4 }
 0x23e   :  { %v1465_v5 = vpop.xlane.xlu1 %1464  ;;  %v1381_v16 = vpop.xlane.xlu2 %1380 }
 0x23f   :  { %v3803_v52 = vmul.f32 0.0051020407, %v1381_v16  ;;  %v1517_v13 = vmul.f32 0.0051020407, %v1465_v5  ;;  %v3816_v34 = vadd.f32 1e-05, %v1558_v31  ;;  %vm1618_vm0 = vweird.f32 %v3801_v7 }
 0x241   :  { %vm1628_vm3 = vweird.f32 %v3816_v34 }
 0x243   :  { %1723 = vxpose.xlu1.b32.start.end [1/1] (short) (narrow) %v1722_v42, 112  ;;  %v3791_v42 = vadd.f32 1e-05, %v1556_v14  ;;  %v1531_v14 = vmul.f32 %v3803_v52, %v3803_v52 }
 0x244   :  { %v1385_v21 = vpop.xlane.xlu0 %1384 }
 0x245   :  { %2532 = vrsqrt.f32 %v3791_v42  ;;  %v3814_v51 = vmul.f32 0.0051020407, %v1385_v21  ;;  %v1545_v15 = vsub.f32 %v1517_v13, %v1531_v14  ;;  %v1597_v14 = vmul.f32 %v2531_v9, %v1596_v8 }
 0x246   :  { %2534 = vrsqrt.f32 %v3801_v7  ;;  %v1469_v22 = vpop.xlane.xlu2 %1468  ;;  %vm1608_vm13 = vweird.f32 %v3791_v42 }
 0x247   :  { %v1532_v5 = vmul.f32 %v3814_v51, %v3814_v51  ;;  %v1518_v41 = vmul.f32 0.0051020407, %v1469_v22  ;;  %2536 = vrsqrt.f32 %v3816_v34  ;;  %v1559_v46 = vmax.f32 %v1545_v15, 0.0 }
 0x249   :  { %v3835_v30 = vadd.f32 1e-05, %v1559_v46 }
 0x24b   :  { %v3807_v54 = vpop.eup %2532  ;;  %2538 = vrsqrt.f32 %v3835_v30  ;;  %vm1638_vm7 = vweird.f32 %v3835_v30 }
 0x24c   :  { %v3770_v57 = vpop.xlane.xlu1 %1388  ;;  %v1603_v50 = vmul.f32 %v3807_v54, %v3791_v42  ;;  %v3821_v55 = vpop.eup %2534  ;;  %vm1609_vm12 = vweird.f32 %v3807_v54 }
 0x24d   :  { %v1613_v60 = vmul.f32 %v3821_v55, %v3801_v7  ;;  %v3838_v4 = vmul.f32 0.0051020407, %v3770_v57  ;;  %vm1610_vm14 = vmor %vm1608_vm13, %vm1609_vm12  ;;  %vm1619_vm15 = vweird.f32 %v3821_v55 }
 0x24e   :  { %v1604_v16 = vmul.f32 %v3807_v54, %v1603_v50  ;;  %v1546_v50 = vsub.f32 %v1518_v41, %v1532_v5  ;;  %v1473_v13 = vpop.xlane.xlu0 %1472  ;;  %vm1620_vm1 = vmor %vm1618_vm0, %vm1619_vm15 }
 0x24f   :  { %v1533_v57 = vmul.f32 %v3838_v4, %v3838_v4  ;;  %v1519_v47 = vmul.f32 0.0051020407, %v1473_v13 }
 0x250   :  { %v1605_v21 = vmul.f32 0.5, %v1604_v16  ;;  %v3843_v16 = vpop.eup %2536  ;;  %v1560_v5 = vmax.f32 %v1546_v50, 0.0 }
 0x251   :  { %v1623_v41 = vmul.f32 %v3843_v16, %v3816_v34  ;;  %v3867_v37 = vpop.eup %2538  ;;  %vm1629_vm2 = vweird.f32 %v3843_v16 }
 0x252   :  { %v1606_v22 = vsub.f32 1.5, %v1605_v21  ;;  %v1547_v21 = vsub.f32 %v1519_v47, %v1533_v57  ;;  %vm1630_vm4 = vmor %vm1628_vm3, %vm1629_vm2  ;;  %vm1639_vm6 = vweird.f32 %v3867_v37 }
 0x253   :  { %vm1640_vm8 = vmor %vm1638_vm7, %vm1639_vm6 }
 0x254   :  { %v1393_v46 = vpop.xlane.xlu2 %1392 }
 0x255   :  { %v3861_v50 = vmul.f32 0.0051020407, %v1393_v46 }
 0x256   :  { %v3776_v19 = vpop.xlane.xlu1 %1476 }
 0x257   :  { %v1534_v42 = vmul.f32 %v3861_v50, %v3861_v50  ;;  %v1520_v57 = vmul.f32 0.0051020407, %v3776_v19 }
 0x259   :  { %v1548_v19 = vsub.f32 %v1520_v57, %v1534_v42 }
 0x25b   :  { %v1562_v42 = vmax.f32 %v1548_v19, 0.0 }
 0x25c   :  { %v1397_v47 = vpop.xlane.xlu0 %1396 }
 0x264   :  { %v3786_v29 = vpop.xlane.xlu1 %1400 }
 0x265   :  { %v3911_v19 = vmul.f32 0.0051020407, %v3786_v29 }
 0x267   :  { %v1536_v29 = vmul.f32 %v3911_v19, %v3911_v19 }
 0x26e   :  { %v3795_v59 = vpop.xlane.xlu1 %1488 }
 0x27c   :  { %v3805_v12 = vpop.xlane.xlu1 %1412 }
 0x2e7   :  { %v3819_v39 = vpop.trf.xlu1 }
 0x2e8   :  { %v3824_v0 = vmul.f32 %v3819_v39, %v1591_v63  ;;  %v1614_v63 = vmul.f32 %v3821_v55, %v1613_v60 }
 0x2ea   :  { %v1769_v31 = vmul.f32 %v3824_v0, %v3766_v43  ;;  %v1601_v43 = vsel %vm1600_vm11, %v2531_v9, %v1597_v14  ;;  %v1615_v60 = vmul.f32 0.5, %v1614_v63  ;;  %v3858_v14 = vadd.f32 1e-05, %v1560_v5 }
 0x2eb   :  { %v1561_v5 = vmax.f32 %v1547_v21, 0.0  ;;  %v1481_v21 = vpop.xlane.xlu2 %1480 }
 0x2ec   :  { %1797 = vrot.lane.b32.xlu2 %v1769_v31, %s2556_s3  ;;  %v1607_v31 = vmul.f32 %v3807_v54, %v1606_v22  ;;  %v1616_v22 = vsub.f32 1.5, %v1615_v60  ;;  %2540 = vrsqrt.f32 %v3858_v14  ;;  %vm1648_vm10 = vweird.f32 %v3858_v14 }
 0x2ed   :  { %v3886_v60 = vadd.f32 1e-05, %v1561_v5  ;;  %v1521_v5 = vmul.f32 0.0051020407, %v1481_v21  ;;  %v1485_v21 = vpop.xlane.xlu0 %1484 }
 0x2ee   :  { %v1611_v13 = vsel %vm1610_vm14, %v3807_v54, %v1607_v31  ;;  %v3883_v31 = vmul.f32 0.0051020407, %v1397_v47 }
 0x2ef   :  { %v3840_v15 = vpop.trf.xlu1  ;;  %2542 = vrsqrt.f32 %v3886_v60  ;;  %vm1658_vm13 = vweird.f32 %v3886_v60 }
 0x2f0   :  { %v3846_v8 = vmul.f32 %v3840_v15, %v1601_v43  ;;  %v1535_v7 = vmul.f32 %v3883_v31, %v3883_v31 }
 0x2f2   :  { %v1770_v9 = vmul.f32 %v3846_v8, %v3772_v62  ;;  %v1624_v62 = vmul.f32 %v3843_v16, %v1623_v41  ;;  %v1617_v41 = vmul.f32 %v3821_v55, %v1616_v22 }
 0x2f4   :  { %1799 = vrot.lane.b32.xlu0 %v1770_v9, %s2556_s3  ;;  %v1633_v9 = vmul.f32 %v3867_v37, %v3835_v30  ;;  %v1625_v46 = vmul.f32 0.5, %v1624_v62 }
 0x2f6   :  { %v1626_v22 = vsub.f32 1.5, %v1625_v46  ;;  %v1634_v62 = vmul.f32 %v3867_v37, %v1633_v9  ;;  %v3908_v46 = vadd.f32 1e-05, %v1562_v42 }
 0x2f7   :  { %v3865_v43 = vpop.trf.xlu1 }
 0x2f8   :  { %v3870_v63 = vmul.f32 %v3865_v43, %v1611_v13  ;;  %v1621_v13 = vsel %vm1620_vm1, %v3821_v55, %v1617_v41  ;;  %v1627_v47 = vmul.f32 %v3843_v16, %v1626_v22  ;;  %v1635_v9 = vmul.f32 0.5, %v1634_v62 }
 0x2f9   :  { %v1549_v41 = vsub.f32 %v1521_v5, %v1535_v7  ;;  %2544 = vrsqrt.f32 %v3908_v46  ;;  %v1522_v5 = vmul.f32 0.0051020407, %v1485_v21  ;;  %vm1668_vm0 = vweird.f32 %v3908_v46 }
 0x2fa   :  { %v1771_v54 = vmul.f32 %v3870_v63, %v3778_v45  ;;  %v3888_v45 = vpop.eup %2540  ;;  %v1636_v33 = vsub.f32 1.5, %v1635_v9 }
 0x2fb   :  { %v1643_v55 = vmul.f32 %v3888_v45, %v3858_v14  ;;  %v3917_v62 = vpop.eup %2542  ;;  %v1563_v34 = vmax.f32 %v1549_v41, 0.0  ;;  %v1550_v41 = vsub.f32 %v1522_v5, %v1536_v29  ;;  %v1523_v29 = vmul.f32 0.0051020407, %v3795_v59 }
 0x2fc   :  { %1801 = vrot.lane.b32.xlu2 %v1771_v54, %s2556_s3  ;;  %vm1649_vm9 = vweird.f32 %v3888_v45  ;;  %vm1659_vm12 = vweird.f32 %v3917_v62 }
 0x2fd   :  { %v3932_v9 = vadd.f32 1e-05, %v1563_v34  ;;  %v1564_v34 = vmax.f32 %v1550_v41, 0.0  ;;  %vm1650_vm11 = vmor %vm1648_vm10, %vm1649_vm9 }
 0x2fe   :  { %vm1660_vm14 = vmor %vm1658_vm13, %vm1659_vm12 }
 0x2ff   :  { %v3891_v32 = vpop.trf.xlu1  ;;  %v2545_v11 = vpop.eup %2544  ;;  %2546 = vrsqrt.f32 %v3932_v9  ;;  %vm1678_vm3 = vweird.f32 %v3932_v9 }
 0x300   :  { %v3895_v54 = vmul.f32 %v3891_v32, %v1621_v13  ;;  %v1631_v13 = vsel %vm1630_vm4, %v3843_v16, %v1627_v47  ;;  %v1653_v16 = vmul.f32 %v3917_v62, %v3886_v60  ;;  %vm1669_vm15 = vweird.f32 %v2545_v11 }
 0x301   :  { %vm1670_vm1 = vmor %vm1668_vm0, %vm1669_vm15 }
 0x302   :  { %v1772_v57 = vmul.f32 %v3895_v54, %v3784_v48  ;;  %v1644_v48 = vmul.f32 %v3888_v45, %v1643_v55  ;;  %v1637_v55 = vmul.f32 %v3867_v37, %v1636_v33 }
 0x304   :  { %1803 = vrot.lane.b32.xlu0 %v1772_v57, %s2556_s3  ;;  %v1405_v57 = vpop.xlane.xlu2 %1404  ;;  %v1645_v47 = vmul.f32 0.5, %v1644_v48 }
 0x305   :  { %v3935_v21 = vmul.f32 0.0051020407, %v1405_v57  ;;  %v3955_v57 = vadd.f32 1e-05, %v1564_v34 }
 0x306   :  { %v1646_v33 = vsub.f32 1.5, %v1645_v47  ;;  %v2547_v47 = vpop.eup %2546 }
 0x307   :  { %v3915_v22 = vpop.trf.xlu1  ;;  %v1537_v30 = vmul.f32 %v3935_v21, %v3935_v21  ;;  %2548 = vrsqrt.f32 %v3955_v57  ;;  %v1673_v34 = vmul.f32 %v2547_v47, %v3932_v9  ;;  %vm1679_vm2 = vweird.f32 %v2547_v47 }
 0x308   :  { %v3920_v7 = vmul.f32 %v3915_v22, %v1631_v13  ;;  %v1641_v13 = vsel %vm1640_vm8, %v3867_v37, %v1637_v55  ;;  %v1663_v37 = vmul.f32 %v2545_v11, %v3908_v46  ;;  %vm1680_vm4 = vmor %vm1678_vm3, %vm1679_vm2  ;;  %vm1688_vm7 = vweird.f32 %v3955_v57 }
 0x309   :  { %v1551_v55 = vsub.f32 %v1523_v29, %v1537_v30 }
 0x30a   :  { %v1773_v42 = vmul.f32 %v3920_v7, %v3793_v27  ;;  %v1654_v27 = vmul.f32 %v3917_v62, %v1653_v16  ;;  %v1664_v59 = vmul.f32 %v2545_v11, %v1663_v37  ;;  %v1674_v37 = vmul.f32 %v2547_v47, %v1673_v34 }
 0x30c   :  { %1805 = vrot.lane.b32.xlu2 %v1773_v42, %s2556_s3  ;;  %v1647_v42 = vmul.f32 %v3888_v45, %v1646_v33  ;;  %v1655_v16 = vmul.f32 0.5, %v1654_v27  ;;  %v1565_v27 = vmax.f32 %v1551_v55, 0.0  ;;  %v1665_v29 = vmul.f32 0.5, %v1664_v59 }
 0x30d   :  { %v2549_v55 = vpop.eup %2548  ;;  %v1675_v60 = vmul.f32 0.5, %v1674_v37 }
 0x30e   :  { %v1651_v41 = vsel %vm1650_vm11, %v3888_v45, %v1647_v42  ;;  %v2557_v45 = vmov 0   ;;  %vm1689_vm6 = vweird.f32 %v2549_v55 }
 0x30f   :  { %v3939_v53 = vpop.trf.xlu1  ;;  %2520 = vset.pattern.permute.xlu0 %v2557_v45  ;;  %2521 = vset.pattern.permute.xlu2 %v2557_v45  ;;  %vm1690_vm8 = vmor %vm1688_vm7, %vm1689_vm6 }
 0x310   :  { %v3942_v48 = vmul.f32 %v3939_v53, %v1641_v13  ;;  %v1656_v13 = vsub.f32 1.5, %v1655_v16  ;;  %v1666_v16 = vsub.f32 1.5, %v1665_v29 }
 0x312   :  { %v1774_v5 = vmul.f32 %v3942_v48, %v3803_v52  ;;  %v1657_v30 = vmul.f32 %v3917_v62, %v1656_v13  ;;  %v1683_v13 = vmul.f32 %v2549_v55, %v3955_v57 }
 0x314   :  { %1807 = vrot.lane.b32.xlu0 %v1774_v5, %s2556_s3  ;;  %v1579_v5 = vadd.f32 1e-05, %v1565_v27  ;;  %v1661_v42 = vsel %vm1660_vm14, %v3917_v62, %v1657_v30  ;;  %v1684_v62 = vmul.f32 %v2549_v55, %v1683_v13  ;;  %v1676_v30 = vsub.f32 1.5, %v1675_v60  ;;  %v1409_v60 = vpop.xlane.xlu0 %1408 }
 0x315   :  { %v1510_v56 = vmul.f32 0.0051020407, %v1409_v60  ;;  %v1511_v60 = vmul.f32 0.0051020407, %v3805_v12 }
 0x316   :  { %2550 = vrsqrt.f32 %v1579_v5  ;;  %v1685_v37 = vmul.f32 0.5, %v1684_v62  ;;  %v1493_v62 = vpop.xlane.xlu2 %1492  ;;  %vm1698_vm10 = vweird.f32 %v1579_v5 }
 0x317   :  { %v3958_v52 = vpop.trf.xlu1 }
 0x318   :  { %v3961_v33 = vmul.f32 %v3958_v52, %v1651_v41  ;;  %v1686_v13 = vsub.f32 1.5, %v1685_v37 }
 0x31a   :  { %v1775_v14 = vmul.f32 %v3961_v33, %v3814_v51 }
 0x31c   :  { %1809 = vrot.lane.b32.xlu2 %v1775_v14, %s2556_s3  ;;  %v1667_v14 = vmul.f32 %v2545_v11, %v1666_v16  ;;  %v2551_v29 = vpop.eup %2550  ;;  %v1677_v16 = vmul.f32 %v2547_v47, %v1676_v30 }
 0x31d   :  { %vm1699_vm9 = vweird.f32 %v2551_v29 }
 0x31e   :  { %v1671_v27 = vsel %vm1670_vm1, %v2545_v11, %v1667_v14  ;;  %v1681_v46 = vsel %vm1680_vm4, %v2547_v47, %v1677_v16  ;;  %v1524_v16 = vmul.f32 0.0051020407, %v1493_v62  ;;  %vm1700_vm11 = vmor %vm1698_vm10, %vm1699_vm9  ;;  %v1539_v62 = vmul.f32 %v1511_v60, %v1511_v60 }
 0x31f   :  { %v3972_v51 = vpop.trf.xlu1 }
 0x320   :  { %v3975_v41 = vmul.f32 %v3972_v51, %v1661_v42  ;;  %v1693_v42 = vmul.f32 %v2551_v29, %v1579_v5 }
 0x322   :  { %v1776_v59 = vmul.f32 %v3975_v41, %v3838_v4  ;;  %v1694_v11 = vmul.f32 %v2551_v29, %v1693_v42  ;;  %v1538_v42 = vmul.f32 %v1510_v56, %v1510_v56 }
 0x324   :  { %1811 = vrot.lane.b32.xlu0 %v1776_v59, %s2556_s3  ;;  %v1695_v30 = vmul.f32 0.5, %v1694_v11  ;;  %v1552_v11 = vsub.f32 %v1524_v16, %v1538_v42 }
 0x327   :  { %v3982_v34 = vpop.trf.xlu1 }
 0x328   :  { %v3985_v45 = vmul.f32 %v3982_v34, %v1671_v27 }
 0x32a   :  { %v1777_v4 = vmul.f32 %v3985_v45, %v3861_v50  ;;  %v1687_v50 = vmul.f32 %v2549_v55, %v1686_v13  ;;  %v1566_v13 = vmax.f32 %v1552_v11, 0.0 }
 0x32c   :  { %1813 = vrot.lane.b32.xlu2 %v1777_v4, %s2556_s3  ;;  %v1691_v9 = vsel %vm1690_vm8, %v2549_v55, %v1687_v50  ;;  %v1696_v4 = vsub.f32 1.5, %v1695_v30  ;;  %v1497_v50 = vpop.xlane.xlu0 %1496  ;;  %v1580_v30 = vadd.f32 1e-05, %v1566_v13 }
 0x32e   :  { %2552 = vrsqrt.f32 %v1580_v30  ;;  %vm1708_vm13 = vweird.f32 %v1580_v30 }
 0x32f   :  { %v3991_v59 = vpop.trf.xlu1 }
 0x330   :  { %v1764_v14 = vmul.f32 %v3991_v59, %v1681_v46  ;;  %v1697_v46 = vmul.f32 %v2551_v29, %v1696_v4 }
 0x332   :  { %v1778_v27 = vmul.f32 %v1764_v14, %v3883_v31  ;;  %v1701_v57 = vsel %vm1700_vm11, %v2551_v29, %v1697_v46 }
 0x334   :  { %1815 = vrot.lane.b32.xlu0 %v1778_v27, %s2556_s3  ;;  %v2553_v12 = vpop.eup %2552 }
 0x335   :  { %v1703_v4 = vmul.f32 %v2553_v12, %v1580_v30  ;;  %vm1709_vm12 = vweird.f32 %v2553_v12 }
 0x336   :  { %vm1710_vm14 = vmor %vm1708_vm13, %vm1709_vm12 }
 0x337   :  { %v3997_v47 = vpop.trf.xlu1 }
 0x338   :  { %v1765_v37 = vmul.f32 %v3997_v47, %v1691_v9  ;;  %v1525_v9 = vmul.f32 0.0051020407, %v1497_v50 }
 0x33a   :  { %v1779_v31 = vmul.f32 %v1765_v37, %v3911_v19 }
 0x33c   :  { %1855 = vperm.xlu0 %2520, %v3824_v0   ;;  %1817 = vrot.lane.b32.xlu2 %v1779_v31, %s2556_s3  ;;  %v1553_v0 = vsub.f32 %v1525_v9, %v1539_v62  ;;  %v2558_v9 = vmov 1  }
 0x33e   :  { %v1567_v5 = vmax.f32 %v1553_v0, 0.0 }
 0x33f   :  { %v4003_v55 = vpop.trf.xlu1 }
 0x340   :  { %v1766_v27 = vmul.f32 %v4003_v55, %v1701_v57  ;;  %v1581_v29 = vadd.f32 1e-05, %v1567_v5 }
 0x342   :  { %v1780_v19 = vmul.f32 %v1766_v27, %v3935_v21  ;;  %2554 = vrsqrt.f32 %v1581_v29  ;;  %vm1718_vm0 = vweird.f32 %v1581_v29 }
 0x344   :  { %1870 = vperm.xlu0 %2520, %v3895_v54   ;;  %1860 = vperm.xlu2 %2521, %v3846_v8   ;;  %v1704_v54 = vmul.f32 %v2553_v12, %v1703_v4 }
 0x345   :  { %1819 = vrot.lane.b32.xlu1 %v1780_v19, %s2556_s3 }
 0x346   :  { %v1705_v21 = vmul.f32 0.5, %v1704_v54  ;;  %v1798_v57 = vpop.permute.xlu2 %1797 }
 0x348   :  { %v2555_v8 = vpop.eup %2554  ;;  %v1706_v16 = vsub.f32 1.5, %v1705_v21 }
 0x349   :  { %v1713_v42 = vmul.f32 %v2555_v8, %v1581_v29  ;;  %vm1719_vm15 = vweird.f32 %v2555_v8 }
 0x34a   :  { %vm1720_vm1 = vmor %vm1718_vm0, %vm1719_vm15 }
 0x34b   :  { %v1714_v31 = vmul.f32 %v2555_v8, %v1713_v42 }
 0x34c   :  { %1880 = vperm.xlu0 %2520, %v3942_v48   ;;  %1865 = vperm.xlu2 %2521, %v3870_v63   ;;  %v1707_v48 = vmul.f32 %v2553_v12, %v1706_v16  ;;  %v4016_v63 = vpop.trf.xlu1 }
 0x354   :  { %1890 = vperm.xlu0 %2520, %v3975_v41   ;;  %1875 = vperm.xlu2 %2521, %v3920_v7   ;;  %v1711_v41 = vsel %vm1710_vm14, %v2553_v12, %v1707_v48  ;;  %v1715_v7 = vmul.f32 0.5, %v1714_v31  ;;  %v1752_v13 = vpop.trf.xlu1 }
 0x355   :  { %v1767_v46 = vmul.f32 %v4016_v63, %v1711_v41 }
 0x356   :  { %v1716_v11 = vsub.f32 1.5, %v1715_v7 }
 0x35c   :  { %1900 = vperm.xlu0 %2520, %v1764_v14   ;;  %1885 = vperm.xlu2 %2521, %v3961_v33   ;;  %v1781_v14 = vmul.f32 %v1767_v46, %v1510_v56  ;;  %v1717_v33 = vmul.f32 %v2555_v8, %v1716_v11 }
 0x35e   :  { %v1721_v50 = vsel %vm1720_vm1, %v2555_v8, %v1717_v33 }
 0x35f   :  { %v1768_v19 = vmul.f32 %v1752_v13, %v1721_v50 }
 0x361   :  { %v1782_v30 = vmul.f32 %v1768_v19, %v1511_v60 }
 0x364   :  { %1895 = vperm.xlu2 %2521, %v3985_v45   ;;  %1910 = vperm.xlu0 %2520, %v1766_v27   ;;  %v1802_v45 = vpop.permute.xlu2 %1801 }
 0x365   :  { %v1841_v12 = vsub.f32 %v3865_v43, %v1802_v45 }
 0x366   :  { %v1800_v27 = vpop.permute.xlu0 %1799 }
 0x367   :  { %v1840_v62 = vsub.f32 %v3840_v15, %v1800_v27 }
 0x36c   :  { %1905 = vperm.xlu2 %2521, %v1765_v37   ;;  %1821 = vrot.lane.b32.xlu0 %v1781_v14, %s2556_s3  ;;  %v1806_v56 = vpop.permute.xlu2 %1805  ;;  %v1839_v37 = vsub.f32 %v3819_v39, %v1798_v57 }
 0x36d   :  { %v1843_v0 = vsub.f32 %v3915_v22, %v1806_v56 }
 0x374   :  { %1915 = vperm.xlu2 %2521, %v1767_v46   ;;  %1920 = vperm.xlu0 %2520, %v1768_v19  }
 0x376   :  { %v1810_v5 = vpop.permute.xlu2 %1809  ;;  %v1804_v15 = vpop.permute.xlu0 %1803 }
 0x377   :  { %v1845_v60 = vsub.f32 %v3958_v52, %v1810_v5  ;;  %v1842_v4 = vsub.f32 %v3891_v32, %v1804_v15 }
 0x37c   :  { %2523 = vset.pattern.permute.xlu0 %v2558_v9  ;;  %1823 = vrot.lane.b32.xlu2 %v1782_v30, %s2556_s3 }
 0x37d   :  { %1958 = vperm.xlu0 %2523, %v1840_v62   ;;  %2522 = vset.pattern.permute.xlu2 %v2558_v9 }
 0x384   :  { %1953 = vperm.xlu2 %2522, %v1839_v37  }
 0x385   :  { %1973 = vperm.xlu0 %2523, %v1843_v0  }
 0x386   :  { %v1814_v29 = vpop.permute.xlu2 %1813  ;;  %v1808_v39 = vpop.permute.xlu0 %1807 }
 0x387   :  { %v1847_v54 = vsub.f32 %v3982_v34, %v1814_v29  ;;  %v1844_v22 = vsub.f32 %v3939_v53, %v1808_v39 }
 0x38c   :  { %1963 = vperm.xlu2 %2522, %v1841_v12  }
 0x38d   :  { %1983 = vperm.xlu0 %2523, %v1845_v60  }
 0x394   :  { %1968 = vperm.xlu2 %2522, %v1842_v4  }
 0x395   :  { %1993 = vperm.xlu0 %2523, %v1847_v54  }
 0x396   :  { %v1818_v21 = vpop.permute.xlu2 %1817  ;;  %v1812_v43 = vpop.permute.xlu0 %1811 }
 0x397   :  { %v1849_v8 = vsub.f32 %v3997_v47, %v1818_v21  ;;  %v1846_v42 = vsub.f32 %v3972_v51, %v1812_v43 }
 0x39c   :  { %1978 = vperm.xlu2 %2522, %v1844_v22  }
 0x39d   :  { %2003 = vperm.xlu0 %2523, %v1849_v8  }
 0x39e   :  { %v1861_v52 = vpop.permute.xlu2 %1860 }
 0x39f   :  { %v1926_v12 = vmul.f32 %v1861_v52, %v3621_v23 }
 0x3a4   :  { %1988 = vperm.xlu2 %2522, %v1846_v42  }
 0x3a6   :  { %v1816_v16 = vpop.permute.xlu0 %1815  ;;  %v1866_v31 = vpop.permute.xlu2 %1865 }
 0x3a7   :  { %v1848_v32 = vsub.f32 %v3991_v59, %v1816_v16 }
 0x3ac   :  { %1998 = vperm.xlu2 %2522, %v1848_v32  }
 0x3ae   :  { %v1856_v34 = vpop.permute.xlu0 %1855  ;;  %v1876_v48 = vpop.permute.xlu2 %1875 }
 0x3af   :  { %v1923_v45 = vmul.f32 %v1856_v34, %v3510_v35  ;;  %v1927_v35 = vmul.f32 %v1866_v31, %v3525_v2  ;;  %v1931_v23 = vmul.f32 %v1876_v48, %v3540_v24 }
 0x3b6   :  { %v1871_v41 = vpop.permute.xlu0 %1870  ;;  %v4033_v7 = vpop.permute.xlu2 %1885 }
 0x3b7   :  { %v1820_v53 = vpop.permute.xlu1 %1819  ;;  %v1929_v5 = vmul.f32 %v1871_v41, %v3535_v38  ;;  %v1930_v2 = vmul.f32 %v1871_v41, %v3640_v44  ;;  %v1932_v44 = vmul.f32 %v1876_v48, %v3651_v18  ;;  %v1935_v18 = vmul.f32 %v4033_v7, %v3555_v36 }
 0x3b8   :  { %v1850_v47 = vsub.f32 %v4003_v55, %v1820_v53  ;;  %v1924_v55 = vmul.f32 %v1856_v34, %v3610_v25  ;;  %v1928_v25 = vmul.f32 %v1866_v31, %v3629_v40  ;;  %v1925_v40 = vmul.f32 %v1861_v52, %v3520_v10 }
 0x3ba   :  { %2008 = vperm.xlu2 %2522, %v1850_v47  }
 0x3be   :  { %v1881_v46 = vpop.permute.xlu0 %1880  ;;  %v4036_v11 = vpop.permute.xlu2 %1895 }
 0x3bf   :  { %v1933_v10 = vmul.f32 %v1881_v46, %v3550_v26  ;;  %v1934_v38 = vmul.f32 %v1881_v46, %v3665_v6  ;;  %v1936_v6 = vmul.f32 %v4033_v7, %v3676_v17  ;;  %v1939_v17 = vmul.f32 %v4036_v11, %v3570_v1 }
 0x3c6   :  { %v1891_v14 = vpop.permute.xlu0 %1890  ;;  %v4038_v51 = vpop.permute.xlu2 %1905 }
 0x3c7   :  { %v1937_v24 = vmul.f32 %v1891_v14, %v3565_v3  ;;  %v1938_v26 = vmul.f32 %v1891_v14, %v3687_v49  ;;  %v1940_v49 = vmul.f32 %v4036_v11, %v3698_v28  ;;  %v1943_v1 = vmul.f32 %v4038_v51, %v3585_v61 }
 0x3ce   :  { %v4040_v33 = vpop.permute.xlu0 %1900  ;;  %v4042_v57 = vpop.permute.xlu2 %1915 }
 0x3cf   :  { %v1941_v36 = vmul.f32 %v4040_v33, %v3580_v20  ;;  %v1942_v3 = vmul.f32 %v4040_v33, %v3709_v58  ;;  %v4210_v20 = vld [vmem:[#allocation5_spill] sm:$0xff] }
 0x3d0   :  { %v1944_v28 = vmul.f32 %v4038_v51, %v4210_v20 }
 0x3d6   :  { %v4044_v59 = vpop.permute.xlu0 %1910  ;;  %v1824_v50 = vpop.permute.xlu2 %1823 }
 0x3d7   :  { %v1852_v19 = vsub.f32 %v1752_v13, %v1824_v50 }
 0x3d9   :  { %2018 = vperm.xlu2 %2522, %v1852_v19   ;;  %v4211_v19 = vld [vmem:[#allocation2_spill] sm:$0xff] }
 0x3de   :  { %v1822_v27 = vpop.permute.xlu0 %1821  ;;  %v1954_v30 = vpop.permute.xlu2 %1953 }
 0x3df   :  { %v1851_v62 = vsub.f32 %v4016_v63, %v1822_v27  ;;  %v2021_v9 = vadd.f32 %v1954_v30, %v1923_v45  ;;  %v2022_v56 = vadd.f32 %v1954_v30, %v1924_v55  ;;  %v1945_v45 = vmul.f32 %v4044_v59, %v4211_v19  ;;  %v4212_v55 = vld [vmem:[#allocation6_spill] sm:$0xff] }
 0x3e0   :  { %v1946_v27 = vmul.f32 %v4044_v59, %v4212_v55 }
 0x3e1   :  { %2049 = vst [vmem:[%s4193_s4] sm:$0xff] %v2021_v9  ;;  %2013 = vperm.xlu0 %2523, %v1851_v62   ;;  %v4213_v62 = vld [vmem:[#allocation4_spill] sm:$0xff] }
 0x3e2   :  { %2050 = vst.msk [vmem:[%s4193_s4 + $0x8] sm:$0xff] %vm1357_vm5, %v2022_v56  ;;  %v4214_v9 = vld [vmem:[#allocation8_spill] sm:$0xff] }
 0x3e6   :  { %v4058_v13 = vpop.permute.xlu0 %1920  ;;  %v1964_v37 = vpop.permute.xlu2 %1963 }
 0x3e7   :  { %v2025_v63 = vadd.f32 %v1964_v37, %v1927_v35  ;;  %v2026_v0 = vadd.f32 %v1964_v37, %v1928_v25  ;;  %v1949_v59 = vmul.f32 %v4058_v13, %v4213_v62  ;;  %v1950_v56 = vmul.f32 %v4058_v13, %v4214_v9 }
 0x3e9   :  { %2053 = vst [vmem:[%s4193_s4 + $0x20] sm:$0xff] %v2025_v63  ;;  %v4215_v63 = vld [vmem:[#allocation3_spill] sm:$0xff] }
 0x3ea   :  { %2054 = vst.msk [vmem:[%s4193_s4 + $0x28] sm:$0xff] %vm1357_vm5, %v2026_v0  ;;  %v1947_v0 = vmul.f32 %v4042_v57, %v4215_v63 }
 0x3ee   :  { %v1969_v60 = vpop.permute.xlu2 %1968 }
 0x3ef   :  { %v2027_v15 = vadd.f32 %v1969_v60, %v1929_v5  ;;  %v2028_v29 = vadd.f32 %v1969_v60, %v1930_v2  ;;  %v1959_v4 = vpop.permute.xlu0 %1958  ;;  %v4216_v5 = vld [vmem:[#allocation7_spill] sm:$0xff] }
 0x3f0   :  { %v2023_v54 = vadd.f32 %v1959_v4, %v1925_v40  ;;  %v2024_v39 = vadd.f32 %v1959_v4, %v1926_v12  ;;  %v1948_v2 = vmul.f32 %v4042_v57, %v4216_v5 }
 0x3f1   :  { %2055 = vst [vmem:[%s4193_s4 + $0x30] sm:$0xff] %v2027_v15 }
 0x3f2   :  { %2056 = vst.msk [vmem:[%s4193_s4 + $0x38] sm:$0xff] %vm1357_vm5, %v2028_v29 }
 0x3f3   :  { %2051 = vst [vmem:[%s4193_s4 + $0x10] sm:$0xff] %v2023_v54 }
 0x3f4   :  { %2052 = vst.msk [vmem:[%s4193_s4 + $0x18] sm:$0xff] %vm1357_vm5, %v2024_v39 }
 0x3f6   :  { %v1979_v21 = vpop.permute.xlu2 %1978 }
 0x3f7   :  { %v2031_v22 = vadd.f32 %v1979_v21, %v1933_v10  ;;  %v2032_v8 = vadd.f32 %v1979_v21, %v1934_v38  ;;  %v1974_v43 = vpop.permute.xlu0 %1973 }
 0x3f8   :  { %v2029_v52 = vadd.f32 %v1974_v43, %v1931_v23  ;;  %v2030_v42 = vadd.f32 %v1974_v43, %v1932_v44 }
 0x3f9   :  { %2059 = vst [vmem:[%s4193_s4 + $0x50] sm:$0xff] %v2031_v22 }
 0x3fa   :  { %2060 = vst.msk [vmem:[%s4193_s4 + $0x58] sm:$0xff] %vm1357_vm5, %v2032_v8 }
 0x3fb   :  { %2057 = vst [vmem:[%s4193_s4 + $0x40] sm:$0xff] %v2029_v52 }
 0x3fc   :  { %2058 = vst.msk [vmem:[%s4193_s4 + $0x48] sm:$0xff] %vm1357_vm5, %v2030_v42 }
 0x3fe   :  { %v1989_v16 = vpop.permute.xlu2 %1988 }
 0x3ff   :  { %v2035_v31 = vadd.f32 %v1989_v16, %v1937_v24  ;;  %v2036_v32 = vadd.f32 %v1989_v16, %v1938_v26  ;;  %v1984_v34 = vpop.permute.xlu0 %1983 }
 0x400   :  { %v2033_v48 = vadd.f32 %v1984_v34, %v1935_v18  ;;  %v2034_v41 = vadd.f32 %v1984_v34, %v1936_v6 }
 0x401   :  { %2063 = vst [vmem:[%s4193_s4 + $0x70] sm:$0xff] %v2035_v31 }
 0x402   :  { %2064 = vst.msk [vmem:[%s4193_s4 + $0x78] sm:$0xff] %vm1357_vm5, %v2036_v32 }
 0x403   :  { %2061 = vst [vmem:[%s4193_s4 + $0x60] sm:$0xff] %v2033_v48 }
 0x404   :  { %2062 = vst.msk [vmem:[%s4193_s4 + $0x68] sm:$0xff] %vm1357_vm5, %v2034_v41 }
 0x406   :  { %v1999_v7 = vpop.permute.xlu2 %1998 }
 0x407   :  { %v2039_v53 = vadd.f32 %v1999_v7, %v1941_v36  ;;  %v2040_v47 = vadd.f32 %v1999_v7, %v1942_v3  ;;  %v1994_v46 = vpop.permute.xlu0 %1993 }
 0x408   :  { %v2037_v14 = vadd.f32 %v1994_v46, %v1939_v17  ;;  %v2038_v50 = vadd.f32 %v1994_v46, %v1940_v49 }
 0x409   :  { %2067 = vst [vmem:[%s4193_s4 + $0x90] sm:$0xff] %v2039_v53 }
 0x40a   :  { %2068 = vst.msk [vmem:[%s4193_s4 + $0x98] sm:$0xff] %vm1357_vm5, %v2040_v47 }
 0x40b   :  { %2065 = vst [vmem:[%s4193_s4 + $0x80] sm:$0xff] %v2037_v14 }
 0x40c   :  { %2066 = vst.msk [vmem:[%s4193_s4 + $0x88] sm:$0xff] %vm1357_vm5, %v2038_v50 }
 0x40f   :  { %v2004_v58 = vpop.permute.xlu0 %2003 }
 0x410   :  { %v2041_v11 = vadd.f32 %v2004_v58, %v1943_v1  ;;  %v2042_v33 = vadd.f32 %v2004_v58, %v1944_v28 }
 0x412   :  { %2069 = vst [vmem:[%s4193_s4 + $0xa0] sm:$0xff] %v2041_v11 }
 0x413   :  { %2070 = vst.msk [vmem:[%s4193_s4 + $0xa8] sm:$0xff] %vm1357_vm5, %v2042_v33 }
 0x414   :  { %v2009_v61 = vpop.permute.xlu2 %2008 }
 0x415   :  { %v2043_v51 = vadd.f32 %v2009_v61, %v1945_v45  ;;  %v2044_v30 = vadd.f32 %v2009_v61, %v1946_v27 }
 0x417   :  { %2071 = vst [vmem:[%s4193_s4 + $0xb0] sm:$0xff] %v2043_v51 }
 0x418   :  { %2072 = vst.msk [vmem:[%s4193_s4 + $0xb8] sm:$0xff] %vm1357_vm5, %v2044_v30 }
 0x433   :  { %v2019_v35 = vpop.permute.xlu2 %2018 }
 0x434   :  { %v2047_v25 = vadd.f32 %v2019_v35, %v1949_v59  ;;  %v2048_v37 = vadd.f32 %v2019_v35, %v1950_v56 }
 0x436   :  { %2075 = vst [vmem:[%s4193_s4 + $0xd0] sm:$0xff] %v2047_v25 }
 0x437   :  { %2076 = vst.msk [vmem:[%s4193_s4 + $0xd8] sm:$0xff] %vm1357_vm5, %v2048_v37 }
 0x453   :  { %v2014_v40 = vpop.permute.xlu0 %2013 }
 0x454   :  { %v2045_v13 = vadd.f32 %v2014_v40, %v1947_v0  ;;  %v2046_v12 = vadd.f32 %v2014_v40, %v1948_v2 }
 0x456   :  { %2073 = vst [vmem:[%s4193_s4 + $0xc0] sm:$0xff] %v2045_v13 }
 0x457   :  { %2074 = vst.msk [vmem:[%s4193_s4 + $0xc8] sm:$0xff] %vm1357_vm5, %v2046_v12 }

</bundles_post_ra>
